<compile_context>
chip_gen: v5e
topology: v5e:2x2
jax: 0.10.0
libtpu: 0.0.40
codegen_flags: <defaults>
</compile_context>

<pallas_src>
import functools

import jax
import jax.numpy as jnp
from jax.experimental import pallas as pl
from jax.experimental.pallas import tpu as pltpu


def _round_up(x, m):
    return ((x + m - 1) // m) * m


# ----------------------------------------------------------------------------
# Fused Pallas kernel: full GRU stack + affine + log-softmax
# ----------------------------------------------------------------------------
def decoder_seq_kernel(x_ref, h0_ref, wih_ref, whh_ref, bgi_ref, bhn_ref,
                       affw_ref, affb_ref, logp_ref, hout_ref):
    """Padded shapes: HP = feature pad (mult of 128), OP = output pad, BP = batch pad (mult of 8).

    x_ref:    (T*BP, HP)     layer-0 input (embeddings), time-major rows [t*BP + b]
    h0_ref:   (L, BP, HP)    initial hidden state (padded lanes zero)
    wih_ref:  (L, HP, 3*HP)  input->gates weights, gate g at cols [g*HP, g*HP+H)
    whh_ref:  (L, HP, 3*HP)  hidden->gates weights
    bgi_ref:  (L, 1, 3*HP)   b_ih (+ b_hh folded in for r,z gates)
    bhn_ref:  (L, 1, HP)     b_hh of the n gate (must stay inside r*(...))
    affw_ref: (HP, OP)       classifier weight, transposed
    affb_ref: (1, OP)        classifier bias, padded lanes = -1e30
    logp_ref: (T*BP, OP)     output log-probs
    hout_ref: (L, BP, HP)    output hidden state
    """
    L, BP, HP = h0_ref.shape
    T = x_ref.shape[0] // BP

    x_all = x_ref[...]                                                  # (T*BP, HP)
    for l in range(L):
        wih = wih_ref[l]                                                # VMEM-resident weights
        whh = whh_ref[l]
        bgi = bgi_ref[l]                                                # (1, 3*HP)
        bhn = bhn_ref[l]                                                # (1, HP)

        # Hoisted input projection: one matmul for all T timesteps of this layer.
        gi_all = jnp.dot(x_all, wih, preferred_element_type=jnp.float32) + bgi

        h = h0_ref[l]                                                   # (BP, HP)
        outs = []
        for t in range(T):                                              # sequential recurrence
            gi = gi_all[t * BP:(t + 1) * BP, :]                         # sublane-aligned slice
            gh = jnp.dot(h, whh, preferred_element_type=jnp.float32)
            r = jax.nn.sigmoid(gi[:, 0:HP] + gh[:, 0:HP])
            z = jax.nn.sigmoid(gi[:, HP:2 * HP] + gh[:, HP:2 * HP])
            n = jnp.tanh(gi[:, 2 * HP:3 * HP] + r * (gh[:, 2 * HP:3 * HP] + bhn))
            h = (1.0 - z) * n + z * h
            outs.append(h)
        hout_ref[l] = h
        x_all = jnp.concatenate(outs, axis=0)                           # next layer's input

    # Fused classifier + log-softmax, consuming the last layer's outputs directly from VMEM.
    logits = jnp.dot(x_all, affw_ref[...], preferred_element_type=jnp.float32) + affb_ref[...]
    m = jnp.max(logits, axis=-1, keepdims=True)
    s = logits - m
    lse = jnp.log(jnp.sum(jnp.exp(s), axis=-1, keepdims=True))
    logp_ref[...] = s - lse


# ----------------------------------------------------------------------------
# Parameters: PyTorch-layout init + packing into the lane-aligned kernel layout
# ----------------------------------------------------------------------------
def init_raw_params(key, output_dim, embed_dim, hidden_dim, num_layers):
    """Parameters in PyTorch's native layout / init distributions."""
    keys = jax.random.split(key, 1 + 4 * num_layers + 2)
    params = {"embed": jax.random.normal(keys[0], (output_dim, embed_dim), jnp.float32)}

    k = 1.0 / (hidden_dim ** 0.5)
    gru = []
    for l in range(num_layers):
        din = embed_dim if l == 0 else hidden_dim
        kk = keys[1 + 4 * l:1 + 4 * (l + 1)]
        gru.append({
            "w_ih": jax.random.uniform(kk[0], (3 * hidden_dim, din), jnp.float32, -k, k),
            "w_hh": jax.random.uniform(kk[1], (3 * hidden_dim, hidden_dim), jnp.float32, -k, k),
            "b_ih": jax.random.uniform(kk[2], (3 * hidden_dim,), jnp.float32, -k, k),
            "b_hh": jax.random.uniform(kk[3], (3 * hidden_dim,), jnp.float32, -k, k),
        })
    params["gru"] = gru
    params["aff_w"] = jax.random.uniform(keys[-2], (output_dim, hidden_dim), jnp.float32, -k, k)
    params["aff_b"] = jax.random.uniform(keys[-1], (output_dim,), jnp.float32, -k, k)
    return params


def pack_params(raw, *, output_dim, embed_dim, hidden_dim, num_layers):
    """Pad/transposes/stacks params into the lane-aligned layout the kernel expects."""
    H = hidden_dim
    L = num_layers
    HP = _round_up(max(embed_dim, hidden_dim), 128)
    OP = _round_up(output_dim, 128)

    wih = jnp.zeros((L, HP, 3 * HP), jnp.float32)
    whh = jnp.zeros((L, HP, 3 * HP), jnp.float32)
    bgi = jnp.zeros((L, 1, 3 * HP), jnp.float32)
    bhn = jnp.zeros((L, 1, HP), jnp.float32)
    for l, p in enumerate(raw["gru"]):
        din = p["w_ih"].shape[1]
        wih_t = p["w_ih"].T                        # (din, 3H), gate order r|z|n
        whh_t = p["w_hh"].T                        # (H,   3H)
        for g in range(3):
            wih = wih.at[l, :din, g * HP:g * HP + H].set(wih_t[:, g * H:(g + 1) * H])
            whh = whh.at[l, :H, g * HP:g * HP + H].set(whh_t[:, g * H:(g + 1) * H])
        b_ih, b_hh = p["b_ih"], p["b_hh"]
        bgi = bgi.at[l, 0, 0 * HP:0 * HP + H].set(b_ih[0:H] + b_hh[0:H])           # r (folded)
        bgi = bgi.at[l, 0, 1 * HP:1 * HP + H].set(b_ih[H:2 * H] + b_hh[H:2 * H])   # z (folded)
        bgi = bgi.at[l, 0, 2 * HP:2 * HP + H].set(b_ih[2 * H:3 * H])               # n (input half)
        bhn = bhn.at[l, 0, :H].set(b_hh[2 * H:3 * H])                              # n (hidden half)

    affw = jnp.zeros((HP, OP), jnp.float32).at[:H, :output_dim].set(raw["aff_w"].T)
    affb = jnp.full((1, OP), -1e30, jnp.float32).at[0, :output_dim].set(raw["aff_b"])
    return {"embed": raw["embed"], "wih": wih, "whh": whh, "bgi": bgi, "bhn": bhn,
            "affw": affw, "affb": affb}


# ----------------------------------------------------------------------------
# Forward pass (mirrors DecoderSeq.forward)
# ----------------------------------------------------------------------------
@functools.partial(jax.jit,
                   static_argnames=("output_dim", "embed_dim", "hidden_dim", "num_layers"))
def decoder_seq_forward(params, input_ids, hidden, *, output_dim, embed_dim, hidden_dim,
                        num_layers):
    """input_ids: integer token ids (any shape; flattened like PyTorch's reshape(1,-1)).
    hidden: (num_layers, B, hidden_dim) with B = input_ids.size // num_layers.
    Returns (log_probs (B, num_layers, output_dim), new_hidden (num_layers, B, hidden_dim))."""
    T = num_layers
    HP = _round_up(max(embed_dim, hidden_dim), 128)
    OP = _round_up(output_dim, 128)

    ids = input_ids.reshape(-1)
    # Embedding gather kept as JAX glue (data-dependent gather); hot path is the fused kernel.
    emb = jnp.take(params["embed"], ids, axis=0)                       # (N, E)
    B = emb.shape[0] // T
    BP = _round_up(B, 8)

    x = emb.reshape(B, T, embed_dim).transpose(1, 0, 2)                # (T, B, E) time-major
    x = jnp.pad(x, ((0, 0), (0, BP - B), (0, HP - embed_dim)))
    x = x.reshape(T * BP, HP)

    h0 = jnp.pad(hidden, ((0, 0), (0, BP - B), (0, HP - hidden_dim)))  # (L, BP, HP)

    vspec = pl.BlockSpec(memory_space=pltpu.MemorySpace.VMEM)
    logp_pad, hout_pad = pl.pallas_call(
        decoder_seq_kernel,
        out_shape=(jax.ShapeDtypeStruct((T * BP, OP), jnp.float32),
                   jax.ShapeDtypeStruct((num_layers, BP, HP), jnp.float32)),
        in_specs=[vspec] * 8,
        out_specs=(vspec, vspec),
    )(x, h0, params["wih"], params["whh"], params["bgi"], params["bhn"],
      params["affw"], params["affb"])

    log_probs = logp_pad.reshape(T, BP, OP)[:, :B, :output_dim].transpose(1, 0, 2)  # (B, T, O)
    hidden_out = hout_pad[:, :B, :hidden_dim]                                       # (L, B, H)
    return log_probs, hidden_out


# ----------------------------------------------------------------------------
# Pure-JAX reference (PyTorch semantics) for correctness checking
# ----------------------------------------------------------------------------
def decoder_seq_reference(raw, input_ids, hidden, *, output_dim, embed_dim, hidden_dim,
                          num_layers):
    H = hidden_dim
    hi = jax.lax.Precision.HIGHEST
    ids = input_ids.reshape(-1)
    emb = jnp.take(raw["embed"], ids, axis=0)
    x = emb.reshape(-1, num_layers, embed_dim)                         # (B, T, E)
    B, T, _ = x.shape
    hs = []
    for l in range(num_layers):
        p = raw["gru"][l]
        h = hidden[l]
        ys = []
        for t in range(T):
            gi = jnp.dot(x[:, t, :], p["w_ih"].T, precision=hi) + p["b_ih"]
            gh = jnp.dot(h, p["w_hh"].T, precision=hi) + p["b_hh"]
            r = jax.nn.sigmoid(gi[:, :H] + gh[:, :H])
            z = jax.nn.sigmoid(gi[:, H:2 * H] + gh[:, H:2 * H])
            n = jnp.tanh(gi[:, 2 * H:] + r * gh[:, 2 * H:])
            h = (1.0 - z) * n + z * h
            ys.append(h)
        x = jnp.stack(ys, axis=1)
        hs.append(h)
    hidden_out = jnp.stack(hs, axis=0)
    logits = jnp.dot(x, raw["aff_w"].T, precision=hi) + raw["aff_b"]
    return jax.nn.log_softmax(logits, axis=-1), hidden_out


if __name__ == "__main__":
    output_dim, embed_dim, hidden_dim, num_layers = 10, 16, 32, 2

    key = jax.random.PRNGKey(0)
    k_param, k_ids, k_h = jax.random.split(key, 3)

    raw = init_raw_params(k_param, output_dim, embed_dim, hidden_dim, num_layers)
    packed = pack_params(raw, output_dim=output_dim, embed_dim=embed_dim,
                         hidden_dim=hidden_dim, num_layers=num_layers)

    # 8 tokens -> reshape(1, 8) -> embed -> reshape(-1, 2, 16): batch 4, seq len 2
    input_ids = jax.random.randint(k_ids, (4, 2), 0, output_dim, dtype=jnp.int32)
    batch = input_ids.size // num_layers
    hidden0 = jax.random.normal(k_h, (num_layers, batch, hidden_dim), jnp.float32)

    log_probs, hidden_out = decoder_seq_forward(
        packed, input_ids, hidden0,
        output_dim=output_dim, embed_dim=embed_dim,
        hidden_dim=hidden_dim, num_layers=num_layers)
    jax.block_until_ready((log_probs, hidden_out))

    assert log_probs.shape == (batch, num_layers, output_dim)
    assert hidden_out.shape == (num_layers, batch, hidden_dim)
    # log_softmax rows must exponentiate-sum to 1
    assert jnp.allclose(jnp.sum(jnp.exp(log_probs), axis=-1), 1.0, atol=1e-5)

    # Compare against the pure-JAX PyTorch-semantics reference.
    ref_lp, ref_h = decoder_seq_reference(
        raw, input_ids, hidden0,
        output_dim=output_dim, embed_dim=embed_dim,
        hidden_dim=hidden_dim, num_layers=num_layers)
    err_lp = float(jnp.max(jnp.abs(log_probs - ref_lp)))
    err_h = float(jnp.max(jnp.abs(hidden_out - ref_h)))
    assert err_lp < 5e-3, f"log_probs max abs err {err_lp}"
    assert err_h < 5e-3, f"hidden max abs err {err_h}"

    print("KERNEL_OK")
</pallas_src>

<mosaic_0001>
module attributes {stable_mosaic.version = 11 : i64} {
  func.func @decoder_seq_kernel(%arg0: memref<16x128xf32, #tpu.memory_space<vmem>>, %arg1: memref<2x8x128xf32, #tpu.memory_space<vmem>>, %arg2: memref<2x128x384xf32, #tpu.memory_space<vmem>>, %arg3: memref<2x128x384xf32, #tpu.memory_space<vmem>>, %arg4: memref<2x1x384xf32, #tpu.memory_space<vmem>>, %arg5: memref<2x1x128xf32, #tpu.memory_space<vmem>>, %arg6: memref<128x128xf32, #tpu.memory_space<vmem>>, %arg7: memref<1x128xf32, #tpu.memory_space<vmem>>, %arg8: memref<16x128xf32, #tpu.memory_space<vmem>>, %arg9: memref<2x8x128xf32, #tpu.memory_space<vmem>>) attributes {dimension_semantics = [], scalar_prefetch = 0 : i64, scratch_operands = 0 : i64, tpu.core_type = #tpu.core_type<tc>} {
    %c0 = arith.constant 0 : index
    %c0_0 = arith.constant 0 : index
    %0 = vector.load %arg0[%c0, %c0_0] : memref<16x128xf32, #tpu.memory_space<vmem>>, vector<16x128xf32>
    %c0_1 = arith.constant 0 : index
    %c0_2 = arith.constant 0 : index
    %c0_3 = arith.constant 0 : index
    %1 = vector.load %arg2[%c0_1, %c0_2, %c0_3] : memref<2x128x384xf32, #tpu.memory_space<vmem>>, vector<1x128x384xf32>
    %2 = vector.shape_cast %1 : vector<1x128x384xf32> to vector<128x384xf32>
    %c0_4 = arith.constant 0 : index
    %c0_5 = arith.constant 0 : index
    %c0_6 = arith.constant 0 : index
    %3 = vector.load %arg3[%c0_4, %c0_5, %c0_6] : memref<2x128x384xf32, #tpu.memory_space<vmem>>, vector<1x128x384xf32>
    %4 = vector.shape_cast %3 : vector<1x128x384xf32> to vector<128x384xf32>
    %c0_7 = arith.constant 0 : index
    %c0_8 = arith.constant 0 : index
    %c0_9 = arith.constant 0 : index
    %5 = vector.load %arg4[%c0_7, %c0_8, %c0_9] : memref<2x1x384xf32, #tpu.memory_space<vmem>>, vector<1x1x384xf32>
    %6 = vector.shape_cast %5 : vector<1x1x384xf32> to vector<1x384xf32>
    %c0_10 = arith.constant 0 : index
    %c0_11 = arith.constant 0 : index
    %c0_12 = arith.constant 0 : index
    %7 = vector.load %arg5[%c0_10, %c0_11, %c0_12] : memref<2x1x128xf32, #tpu.memory_space<vmem>>, vector<1x1x128xf32>
    %8 = vector.shape_cast %7 : vector<1x1x128xf32> to vector<1x128xf32>
    %cst = arith.constant dense<0.000000e+00> : vector<16x384xf32>
    %9 = tpu.matmul %0, %2, %cst {dimension_numbers = #tpu.dot_dimension_numbers<[1], [0], [0], [1], [0, 0, 1, 1], [], []>} : vector<16x128xf32>, vector<128x384xf32>, vector<16x384xf32> -> vector<16x384xf32>
    %10 = vector.broadcast %6 : vector<1x384xf32> to vector<16x384xf32>
    %11 = arith.addf %9, %10 : vector<16x384xf32>
    %c0_13 = arith.constant 0 : index
    %c0_14 = arith.constant 0 : index
    %c0_15 = arith.constant 0 : index
    %12 = vector.load %arg1[%c0_13, %c0_14, %c0_15] : memref<2x8x128xf32, #tpu.memory_space<vmem>>, vector<1x8x128xf32>
    %13 = vector.shape_cast %12 : vector<1x8x128xf32> to vector<8x128xf32>
    %14 = vector.extract_strided_slice %11 {offsets = [0, 0], sizes = [8, 384], strides = [1, 1]} : vector<16x384xf32> to vector<8x384xf32>
    %cst_16 = arith.constant dense<0.000000e+00> : vector<8x384xf32>
    %15 = tpu.matmul %13, %4, %cst_16 {dimension_numbers = #tpu.dot_dimension_numbers<[1], [0], [0], [1], [0, 0, 1, 1], [], []>} : vector<8x128xf32>, vector<128x384xf32>, vector<8x384xf32> -> vector<8x384xf32>
    %16 = vector.extract_strided_slice %14 {offsets = [0, 0], sizes = [8, 128], strides = [1, 1]} : vector<8x384xf32> to vector<8x128xf32>
    %17 = vector.extract_strided_slice %15 {offsets = [0, 0], sizes = [8, 128], strides = [1, 1]} : vector<8x384xf32> to vector<8x128xf32>
    %18 = arith.addf %16, %17 : vector<8x128xf32>
    %19 = arith.negf %18 : vector<8x128xf32>
    %20 = math.exp %19 : vector<8x128xf32>
    %cst_17 = arith.constant 1.000000e+00 : f32
    %21 = vector.broadcast %cst_17 : f32 to vector<8x128xf32>
    %22 = arith.addf %21, %20 : vector<8x128xf32>
    %23 = arith.divf %21, %22 : vector<8x128xf32>
    %24 = vector.extract_strided_slice %14 {offsets = [0, 128], sizes = [8, 128], strides = [1, 1]} : vector<8x384xf32> to vector<8x128xf32>
    %25 = vector.extract_strided_slice %15 {offsets = [0, 128], sizes = [8, 128], strides = [1, 1]} : vector<8x384xf32> to vector<8x128xf32>
    %26 = arith.addf %24, %25 : vector<8x128xf32>
    %27 = arith.negf %26 : vector<8x128xf32>
    %28 = math.exp %27 : vector<8x128xf32>
    %cst_18 = arith.constant 1.000000e+00 : f32
    %29 = vector.broadcast %cst_18 : f32 to vector<8x128xf32>
    %30 = arith.addf %29, %28 : vector<8x128xf32>
    %31 = arith.divf %29, %30 : vector<8x128xf32>
    %32 = vector.extract_strided_slice %14 {offsets = [0, 256], sizes = [8, 128], strides = [1, 1]} : vector<8x384xf32> to vector<8x128xf32>
    %33 = vector.extract_strided_slice %15 {offsets = [0, 256], sizes = [8, 128], strides = [1, 1]} : vector<8x384xf32> to vector<8x128xf32>
    %34 = vector.broadcast %8 : vector<1x128xf32> to vector<8x128xf32>
    %35 = arith.addf %33, %34 : vector<8x128xf32>
    %36 = arith.mulf %23, %35 : vector<8x128xf32>
    %37 = arith.addf %32, %36 : vector<8x128xf32>
    %38 = math.tanh %37 : vector<8x128xf32>
    %cst_19 = arith.constant 1.000000e+00 : f32
    %39 = vector.broadcast %cst_19 : f32 to vector<8x128xf32>
    %40 = arith.subf %39, %31 : vector<8x128xf32>
    %41 = arith.mulf %40, %38 : vector<8x128xf32>
    %42 = arith.mulf %31, %13 : vector<8x128xf32>
    %43 = arith.addf %41, %42 : vector<8x128xf32>
    %44 = vector.extract_strided_slice %11 {offsets = [8, 0], sizes = [8, 384], strides = [1, 1]} : vector<16x384xf32> to vector<8x384xf32>
    %cst_20 = arith.constant dense<0.000000e+00> : vector<8x384xf32>
    %45 = tpu.matmul %43, %4, %cst_20 {dimension_numbers = #tpu.dot_dimension_numbers<[1], [0], [0], [1], [0, 0, 1, 1], [], []>} : vector<8x128xf32>, vector<128x384xf32>, vector<8x384xf32> -> vector<8x384xf32>
    %46 = vector.extract_strided_slice %44 {offsets = [0, 0], sizes = [8, 128], strides = [1, 1]} : vector<8x384xf32> to vector<8x128xf32>
    %47 = vector.extract_strided_slice %45 {offsets = [0, 0], sizes = [8, 128], strides = [1, 1]} : vector<8x384xf32> to vector<8x128xf32>
    %48 = arith.addf %46, %47 : vector<8x128xf32>
    %49 = arith.negf %48 : vector<8x128xf32>
    %50 = math.exp %49 : vector<8x128xf32>
    %cst_21 = arith.constant 1.000000e+00 : f32
    %51 = vector.broadcast %cst_21 : f32 to vector<8x128xf32>
    %52 = arith.addf %51, %50 : vector<8x128xf32>
    %53 = arith.divf %51, %52 : vector<8x128xf32>
    %54 = vector.extract_strided_slice %44 {offsets = [0, 128], sizes = [8, 128], strides = [1, 1]} : vector<8x384xf32> to vector<8x128xf32>
    %55 = vector.extract_strided_slice %45 {offsets = [0, 128], sizes = [8, 128], strides = [1, 1]} : vector<8x384xf32> to vector<8x128xf32>
    %56 = arith.addf %54, %55 : vector<8x128xf32>
    %57 = arith.negf %56 : vector<8x128xf32>
    %58 = math.exp %57 : vector<8x128xf32>
    %cst_22 = arith.constant 1.000000e+00 : f32
    %59 = vector.broadcast %cst_22 : f32 to vector<8x128xf32>
    %60 = arith.addf %59, %58 : vector<8x128xf32>
    %61 = arith.divf %59, %60 : vector<8x128xf32>
    %62 = vector.extract_strided_slice %44 {offsets = [0, 256], sizes = [8, 128], strides = [1, 1]} : vector<8x384xf32> to vector<8x128xf32>
    %63 = vector.extract_strided_slice %45 {offsets = [0, 256], sizes = [8, 128], strides = [1, 1]} : vector<8x384xf32> to vector<8x128xf32>
    %64 = vector.broadcast %8 : vector<1x128xf32> to vector<8x128xf32>
    %65 = arith.addf %63, %64 : vector<8x128xf32>
    %66 = arith.mulf %53, %65 : vector<8x128xf32>
    %67 = arith.addf %62, %66 : vector<8x128xf32>
    %68 = math.tanh %67 : vector<8x128xf32>
    %cst_23 = arith.constant 1.000000e+00 : f32
    %69 = vector.broadcast %cst_23 : f32 to vector<8x128xf32>
    %70 = arith.subf %69, %61 : vector<8x128xf32>
    %71 = arith.mulf %70, %68 : vector<8x128xf32>
    %72 = arith.mulf %61, %43 : vector<8x128xf32>
    %73 = arith.addf %71, %72 : vector<8x128xf32>
    %c0_24 = arith.constant 0 : index
    %c0_25 = arith.constant 0 : index
    %c0_26 = arith.constant 0 : index
    %74 = vector.load %arg9[%c0_24, %c0_25, %c0_26] : memref<2x8x128xf32, #tpu.memory_space<vmem>>, vector<1x8x128xf32>
    %75 = vector.shape_cast %74 : vector<1x8x128xf32> to vector<8x128xf32>
    %76 = vector.shape_cast %73 : vector<8x128xf32> to vector<1x8x128xf32>
    tpu.vector_store %arg9[%c0_24, %c0_25, %c0_26], %76 {strides = array<i32>} : memref<2x8x128xf32, #tpu.memory_space<vmem>>, vector<1x8x128xf32>,
    %77 = tpu.concatenate %43, %73 in 0 : vector<8x128xf32>, vector<8x128xf32> -> vector<16x128xf32>
    %c1 = arith.constant 1 : index
    %c0_27 = arith.constant 0 : index
    %c0_28 = arith.constant 0 : index
    %78 = vector.load %arg2[%c1, %c0_27, %c0_28] : memref<2x128x384xf32, #tpu.memory_space<vmem>>, vector<1x128x384xf32>
    %79 = vector.shape_cast %78 : vector<1x128x384xf32> to vector<128x384xf32>
    %c1_29 = arith.constant 1 : index
    %c0_30 = arith.constant 0 : index
    %c0_31 = arith.constant 0 : index
    %80 = vector.load %arg3[%c1_29, %c0_30, %c0_31] : memref<2x128x384xf32, #tpu.memory_space<vmem>>, vector<1x128x384xf32>
    %81 = vector.shape_cast %80 : vector<1x128x384xf32> to vector<128x384xf32>
    %c1_32 = arith.constant 1 : index
    %c0_33 = arith.constant 0 : index
    %c0_34 = arith.constant 0 : index
    %82 = vector.load %arg4[%c1_32, %c0_33, %c0_34] : memref<2x1x384xf32, #tpu.memory_space<vmem>>, vector<1x1x384xf32>
    %83 = vector.shape_cast %82 : vector<1x1x384xf32> to vector<1x384xf32>
    %c1_35 = arith.constant 1 : index
    %c0_36 = arith.constant 0 : index
    %c0_37 = arith.constant 0 : index
    %84 = vector.load %arg5[%c1_35, %c0_36, %c0_37] : memref<2x1x128xf32, #tpu.memory_space<vmem>>, vector<1x1x128xf32>
    %85 = vector.shape_cast %84 : vector<1x1x128xf32> to vector<1x128xf32>
    %cst_38 = arith.constant dense<0.000000e+00> : vector<16x384xf32>
    %86 = tpu.matmul %77, %79, %cst_38 {dimension_numbers = #tpu.dot_dimension_numbers<[1], [0], [0], [1], [0, 0, 1, 1], [], []>} : vector<16x128xf32>, vector<128x384xf32>, vector<16x384xf32> -> vector<16x384xf32>
    %87 = vector.broadcast %83 : vector<1x384xf32> to vector<16x384xf32>
    %88 = arith.addf %86, %87 : vector<16x384xf32>
    %c1_39 = arith.constant 1 : index
    %c0_40 = arith.constant 0 : index
    %c0_41 = arith.constant 0 : index
    %89 = vector.load %arg1[%c1_39, %c0_40, %c0_41] : memref<2x8x128xf32, #tpu.memory_space<vmem>>, vector<1x8x128xf32>
    %90 = vector.shape_cast %89 : vector<1x8x128xf32> to vector<8x128xf32>
    %91 = vector.extract_strided_slice %88 {offsets = [0, 0], sizes = [8, 384], strides = [1, 1]} : vector<16x384xf32> to vector<8x384xf32>
    %cst_42 = arith.constant dense<0.000000e+00> : vector<8x384xf32>
    %92 = tpu.matmul %90, %81, %cst_42 {dimension_numbers = #tpu.dot_dimension_numbers<[1], [0], [0], [1], [0, 0, 1, 1], [], []>} : vector<8x128xf32>, vector<128x384xf32>, vector<8x384xf32> -> vector<8x384xf32>
    %93 = vector.extract_strided_slice %91 {offsets = [0, 0], sizes = [8, 128], strides = [1, 1]} : vector<8x384xf32> to vector<8x128xf32>
    %94 = vector.extract_strided_slice %92 {offsets = [0, 0], sizes = [8, 128], strides = [1, 1]} : vector<8x384xf32> to vector<8x128xf32>
    %95 = arith.addf %93, %94 : vector<8x128xf32>
    %96 = arith.negf %95 : vector<8x128xf32>
    %97 = math.exp %96 : vector<8x128xf32>
    %cst_43 = arith.constant 1.000000e+00 : f32
    %98 = vector.broadcast %cst_43 : f32 to vector<8x128xf32>
    %99 = arith.addf %98, %97 : vector<8x128xf32>
    %100 = arith.divf %98, %99 : vector<8x128xf32>
    %101 = vector.extract_strided_slice %91 {offsets = [0, 128], sizes = [8, 128], strides = [1, 1]} : vector<8x384xf32> to vector<8x128xf32>
    %102 = vector.extract_strided_slice %92 {offsets = [0, 128], sizes = [8, 128], strides = [1, 1]} : vector<8x384xf32> to vector<8x128xf32>
    %103 = arith.addf %101, %102 : vector<8x128xf32>
    %104 = arith.negf %103 : vector<8x128xf32>
    %105 = math.exp %104 : vector<8x128xf32>
    %cst_44 = arith.constant 1.000000e+00 : f32
    %106 = vector.broadcast %cst_44 : f32 to vector<8x128xf32>
    %107 = arith.addf %106, %105 : vector<8x128xf32>
    %108 = arith.divf %106, %107 : vector<8x128xf32>
    %109 = vector.extract_strided_slice %91 {offsets = [0, 256], sizes = [8, 128], strides = [1, 1]} : vector<8x384xf32> to vector<8x128xf32>
    %110 = vector.extract_strided_slice %92 {offsets = [0, 256], sizes = [8, 128], strides = [1, 1]} : vector<8x384xf32> to vector<8x128xf32>
    %111 = vector.broadcast %85 : vector<1x128xf32> to vector<8x128xf32>
    %112 = arith.addf %110, %111 : vector<8x128xf32>
    %113 = arith.mulf %100, %112 : vector<8x128xf32>
    %114 = arith.addf %109, %113 : vector<8x128xf32>
    %115 = math.tanh %114 : vector<8x128xf32>
    %cst_45 = arith.constant 1.000000e+00 : f32
    %116 = vector.broadcast %cst_45 : f32 to vector<8x128xf32>
    %117 = arith.subf %116, %108 : vector<8x128xf32>
    %118 = arith.mulf %117, %115 : vector<8x128xf32>
    %119 = arith.mulf %108, %90 : vector<8x128xf32>
    %120 = arith.addf %118, %119 : vector<8x128xf32>
    %121 = vector.extract_strided_slice %88 {offsets = [8, 0], sizes = [8, 384], strides = [1, 1]} : vector<16x384xf32> to vector<8x384xf32>
    %cst_46 = arith.constant dense<0.000000e+00> : vector<8x384xf32>
    %122 = tpu.matmul %120, %81, %cst_46 {dimension_numbers = #tpu.dot_dimension_numbers<[1], [0], [0], [1], [0, 0, 1, 1], [], []>} : vector<8x128xf32>, vector<128x384xf32>, vector<8x384xf32> -> vector<8x384xf32>
    %123 = vector.extract_strided_slice %121 {offsets = [0, 0], sizes = [8, 128], strides = [1, 1]} : vector<8x384xf32> to vector<8x128xf32>
    %124 = vector.extract_strided_slice %122 {offsets = [0, 0], sizes = [8, 128], strides = [1, 1]} : vector<8x384xf32> to vector<8x128xf32>
    %125 = arith.addf %123, %124 : vector<8x128xf32>
    %126 = arith.negf %125 : vector<8x128xf32>
    %127 = math.exp %126 : vector<8x128xf32>
    %cst_47 = arith.constant 1.000000e+00 : f32
    %128 = vector.broadcast %cst_47 : f32 to vector<8x128xf32>
    %129 = arith.addf %128, %127 : vector<8x128xf32>
    %130 = arith.divf %128, %129 : vector<8x128xf32>
    %131 = vector.extract_strided_slice %121 {offsets = [0, 128], sizes = [8, 128], strides = [1, 1]} : vector<8x384xf32> to vector<8x128xf32>
    %132 = vector.extract_strided_slice %122 {offsets = [0, 128], sizes = [8, 128], strides = [1, 1]} : vector<8x384xf32> to vector<8x128xf32>
    %133 = arith.addf %131, %132 : vector<8x128xf32>
    %134 = arith.negf %133 : vector<8x128xf32>
    %135 = math.exp %134 : vector<8x128xf32>
    %cst_48 = arith.constant 1.000000e+00 : f32
    %136 = vector.broadcast %cst_48 : f32 to vector<8x128xf32>
    %137 = arith.addf %136, %135 : vector<8x128xf32>
    %138 = arith.divf %136, %137 : vector<8x128xf32>
    %139 = vector.extract_strided_slice %121 {offsets = [0, 256], sizes = [8, 128], strides = [1, 1]} : vector<8x384xf32> to vector<8x128xf32>
    %140 = vector.extract_strided_slice %122 {offsets = [0, 256], sizes = [8, 128], strides = [1, 1]} : vector<8x384xf32> to vector<8x128xf32>
    %141 = vector.broadcast %85 : vector<1x128xf32> to vector<8x128xf32>
    %142 = arith.addf %140, %141 : vector<8x128xf32>
    %143 = arith.mulf %130, %142 : vector<8x128xf32>
    %144 = arith.addf %139, %143 : vector<8x128xf32>
    %145 = math.tanh %144 : vector<8x128xf32>
    %cst_49 = arith.constant 1.000000e+00 : f32
    %146 = vector.broadcast %cst_49 : f32 to vector<8x128xf32>
    %147 = arith.subf %146, %138 : vector<8x128xf32>
    %148 = arith.mulf %147, %145 : vector<8x128xf32>
    %149 = arith.mulf %138, %120 : vector<8x128xf32>
    %150 = arith.addf %148, %149 : vector<8x128xf32>
    %c1_50 = arith.constant 1 : index
    %c0_51 = arith.constant 0 : index
    %c0_52 = arith.constant 0 : index
    %151 = vector.load %arg9[%c1_50, %c0_51, %c0_52] : memref<2x8x128xf32, #tpu.memory_space<vmem>>, vector<1x8x128xf32>
    %152 = vector.shape_cast %151 : vector<1x8x128xf32> to vector<8x128xf32>
    %153 = vector.shape_cast %150 : vector<8x128xf32> to vector<1x8x128xf32>
    tpu.vector_store %arg9[%c1_50, %c0_51, %c0_52], %153 {strides = array<i32>} : memref<2x8x128xf32, #tpu.memory_space<vmem>>, vector<1x8x128xf32>,
    %154 = tpu.concatenate %120, %150 in 0 : vector<8x128xf32>, vector<8x128xf32> -> vector<16x128xf32>
    %c0_53 = arith.constant 0 : index
    %c0_54 = arith.constant 0 : index
    %155 = vector.load %arg6[%c0_53, %c0_54] : memref<128x128xf32, #tpu.memory_space<vmem>>, vector<128x128xf32>
    %cst_55 = arith.constant dense<0.000000e+00> : vector<16x128xf32>
    %156 = tpu.matmul %154, %155, %cst_55 {dimension_numbers = #tpu.dot_dimension_numbers<[1], [0], [0], [1], [0, 0, 1, 1], [], []>} : vector<16x128xf32>, vector<128x128xf32>, vector<16x128xf32> -> vector<16x128xf32>
    %c0_56 = arith.constant 0 : index
    %c0_57 = arith.constant 0 : index
    %157 = vector.load %arg7[%c0_56, %c0_57] : memref<1x128xf32, #tpu.memory_space<vmem>>, vector<1x128xf32>
    %158 = vector.broadcast %157 : vector<1x128xf32> to vector<16x128xf32>
    %159 = arith.addf %156, %158 : vector<16x128xf32>
    %cst_58 = arith.constant dense<0xFF800000> : vector<16xf32>
    %160 = vector.multi_reduction <maximumf>, %159, %cst_58 [1] : vector<16x128xf32> to vector<16xf32>
    %161 = vector.shape_cast %160 : vector<16xf32> to vector<16x1xf32>
    %162 = vector.broadcast %161 : vector<16x1xf32> to vector<16x128xf32>
    %163 = arith.subf %159, %162 : vector<16x128xf32>
    %164 = math.exp %163 : vector<16x128xf32>
    %cst_59 = arith.constant dense<0.000000e+00> : vector<16xf32>
    %165 = vector.multi_reduction <add>, %164, %cst_59 [1] : vector<16x128xf32> to vector<16xf32>
    %166 = vector.shape_cast %165 : vector<16xf32> to vector<16x1xf32>
    %167 = math.log %166 : vector<16x1xf32>
    %168 = vector.broadcast %167 : vector<16x1xf32> to vector<16x128xf32>
    %169 = arith.subf %163, %168 : vector<16x128xf32>
    %c0_60 = arith.constant 0 : index
    %c0_61 = arith.constant 0 : index
    %170 = vector.load %arg8[%c0_60, %c0_61] : memref<16x128xf32, #tpu.memory_space<vmem>>, vector<16x128xf32>
    tpu.vector_store %arg8[%c0_60, %c0_61], %169 {strides = array<i32>} : memref<16x128xf32, #tpu.memory_space<vmem>>, vector<16x128xf32>,
    return
  }
}

</mosaic_0001>

<bundles_post_ra>
// kernel: decoder_seq_forward.1
= control target key start
LH: loop header
LB: loop body
LE: loop exit
PB: predicated region body
PF: predicated region fallthrough
CT: control target
= control target key end

     0   :  { %15 = vsyncpa [#allocation3], 0  ;;  %s1530_s0 = inlined_call_operand.vmem [shape: f32[16,128], index: 0, kind: input, shape index: {}]   ;;  %s1531_s1 = inlined_call_operand.vmem [shape: f32[2,8,128], index: 1, kind: input, shape index: {}]   ;;  %s1532_s2 = inlined_call_operand.hbm [shape: f32[2,128,384], index: 2, kind: input, shape index: {}]   ;;  %s1533_s3 = inlined_call_operand.hbm [shape: f32[2,128,384], index: 3, kind: input, shape index: {}]   ;;  %s1534_s4 = inlined_call_operand.vmem [shape: f32[2,1,384], index: 4, kind: input, shape index: {}]   ;;  %s1535_s5 = inlined_call_operand.vmem [shape: f32[2,1,128], index: 5, kind: input, shape index: {}]   ;;  %s1536_s6 = inlined_call_operand.vmem [shape: f32[128,128], index: 6, kind: input, shape index: {}]   ;;  %s1537_s7 = inlined_call_operand.vmem [shape: f32[1,128], index: 7, kind: input, shape index: {}]   ;;  %s1538_s8 = inlined_call_operand.vmem [shape: f32[16,128], index: 8, kind: output, shape index: {0}]   ;;  %s1539_s9 = inlined_call_operand.vmem [shape: f32[2,8,128], index: 9, kind: output, shape index: {1}]  }
   0x1   :  { %s25_s11 = sshll.u32 %s1532_s2, 4  ;;  %s26_s11 = int_to_ptr.hbm [resolvable:$true] %s25_s11 }
   0x2   :  { %16 = vsyncpa [#allocation5], 0  ;;  %s1055_s12 = smov [#allocation2]   ;;  %s38_s16 = sshll.u32 %s1533_s3, 4  ;;  %s39_s16 = int_to_ptr.hbm [resolvable:$true] %s38_s16 }
   0x3   :  { %s27_s13 = sshll.u32 %s1055_s12, 4  ;;  %s1056_s17 = smov 384   ;;  %s28_s13 = int_to_ptr.vmem [resolvable:$true] %s27_s13 }
   0x4   :  { %s1057_s18 = smov 24   ;;  %s1058_s19 = smov [#allocation4]  }
   0x5   :  { %33 = dma.hbm_to_vmem [thread:$0]  %s26_s11, 12288, %s28_s13, [#allocation3], %s1056_s17, %s1056_s17, %s1057_s18  }
   0x6   :  { %s40_s20 = sshll.u32 %s1058_s19, 4  ;;  %s41_s20 = int_to_ptr.vmem [resolvable:$true] %s40_s20 }
   0x7   :  { %46 = dma.hbm_to_vmem [thread:$0]  %s39_s16, 12288, %s41_s20, [#allocation5], %s1056_s17, %s1056_s17, %s1057_s18  }
   0x8   :  { %1051 = dma.done.wait [#allocation3], 12288  }
   0x9   :  { %1052 = vsyncadd [#allocation3], 4294955008 }
   0xa   :  { %1053 = dma.done.wait [#allocation5], 12288  }
   0xb   :  { %1054 = vsyncadd [#allocation5], 4294955008  ;;  %v112_v0 = vld [vmem:[#allocation2 + $0x178] sm:$0xff]  ;;  %v110_v1 = vld [vmem:[#allocation2 + $0x168] sm:$0xff] }
   0xc   :  { %v109_v2 = vld [vmem:[#allocation2 + $0x160] sm:$0xff]  ;;  %216 = vmatpush.msra.mxu3 %v112_v0  ;;  %170 = vmatpush.msra.mxu0 %v110_v1  ;;  %v107_v3 = vld [vmem:[#allocation2 + $0x150] sm:$0xff]  ;;  %v106_v4 = vld [vmem:[#allocation2 + $0x148] sm:$0xff] }
   0xd   :  { %v104_v5 = vld [vmem:[#allocation2 + $0x138] sm:$0xff]  ;;  %v103_v6 = vld [vmem:[#allocation2 + $0x130] sm:$0xff]  ;;  %v101_v7 = vld [vmem:[#allocation2 + $0x120] sm:$0xff] }
   0xe   :  { %217 = vmatpush.msra.mxu3 %v109_v2  ;;  %171 = vmatpush.msra.mxu0 %v107_v3  ;;  %v100_v8 = vld [vmem:[#allocation2 + $0x118] sm:$0xff]  ;;  %v98_v9 = vld [vmem:[#allocation2 + $0x108] sm:$0xff]  ;;  %v97_v10 = vld [vmem:[#allocation2 + $0x100] sm:$0xff] }
   0xf   :  { %v95_v11 = vld [vmem:[#allocation2 + $0xf0] sm:$0xff]  ;;  %v94_v12 = vld [vmem:[#allocation2 + $0xe8] sm:$0xff]  ;;  %v92_v13 = vld [vmem:[#allocation2 + $0xd8] sm:$0xff] }
  0x10   :  { %218 = vmatpush.msra.mxu3 %v106_v4  ;;  %172 = vmatpush.msra.mxu0 %v104_v5  ;;  %v111_v14 = vld [vmem:[#allocation2 + $0x170] sm:$0xff]  ;;  %v1115_v15 = vld [vmem:[#allocation4 + $0x168] sm:$0xff]  ;;  %v108_v16 = vld [vmem:[#allocation2 + $0x158] sm:$0xff] }
  0x11   :  { %v91_v17 = vld [vmem:[#allocation2 + $0xd0] sm:$0xff]  ;;  %v89_v18 = vld [vmem:[#allocation2 + $0xc0] sm:$0xff]  ;;  %193 = vmatpush.msra.mxu1 %v111_v14  ;;  %351 = vmatpush.msra.mxu2 %v1115_v15  ;;  %v88_v21 = vld [vmem:[#allocation2 + $0xb8] sm:$0xff] }
  0x12   :  { %219 = vmatpush.msra.mxu3 %v103_v6  ;;  %173 = vmatpush.msra.mxu0 %v101_v7  ;;  %v1118_v19 = vld [vmem:[#allocation4 + $0x150] sm:$0xff]  ;;  %v105_v20 = vld [vmem:[#allocation2 + $0x140] sm:$0xff]  ;;  %v86_v22 = vld [vmem:[#allocation2 + $0xa8] sm:$0xff] }
  0x13   :  { %194 = vmatpush.msra.mxu1 %v108_v16  ;;  %352 = vmatpush.msra.mxu2 %v1118_v19  ;;  %v1121_v23 = vld [vmem:[#allocation4 + $0x138] sm:$0xff]  ;;  %v102_v24 = vld [vmem:[#allocation2 + $0x128] sm:$0xff]  ;;  %v85_v25 = vld [vmem:[#allocation2 + $0xa0] sm:$0xff] }
  0x14   :  { %220 = vmatpush.msra.mxu3 %v100_v8  ;;  %174 = vmatpush.msra.mxu0 %v98_v9  ;;  %v83_v26 = vld [vmem:[#allocation2 + $0x90] sm:$0xff]  ;;  %v1124_v27 = vld [vmem:[#allocation4 + $0x120] sm:$0xff]  ;;  %v82_v29 = vld [vmem:[#allocation2 + $0x88] sm:$0xff] }
  0x15   :  { %195 = vmatpush.msra.mxu1 %v105_v20  ;;  %353 = vmatpush.msra.mxu2 %v1121_v23  ;;  %v99_v28 = vld [vmem:[#allocation2 + $0x110] sm:$0xff]  ;;  %v80_v30 = vld [vmem:[#allocation2 + $0x78] sm:$0xff]  ;;  %v1127_v31 = vld [vmem:[#allocation4 + $0x108] sm:$0xff] }
  0x16   :  { %221 = vmatpush.msra.mxu3 %v97_v10  ;;  %175 = vmatpush.msra.mxu0 %v95_v11  ;;  %v96_v32 = vld [vmem:[#allocation2 + $0xf8] sm:$0xff]  ;;  %v79_v33 = vld [vmem:[#allocation2 + $0x70] sm:$0xff]  ;;  %v77_v34 = vld [vmem:[#allocation2 + $0x60] sm:$0xff] }
  0x17   :  { %196 = vmatpush.msra.mxu1 %v102_v24  ;;  %354 = vmatpush.msra.mxu2 %v1124_v27  ;;  %v1130_v35 = vld [vmem:[#allocation4 + $0xf0] sm:$0xff]  ;;  %v93_v36 = vld [vmem:[#allocation2 + $0xe0] sm:$0xff]  ;;  %v76_v37 = vld [vmem:[#allocation2 + $0x58] sm:$0xff] }
  0x18   :  { %222 = vmatpush.msra.mxu3 %v94_v12  ;;  %176 = vmatpush.msra.mxu0 %v92_v13  ;;  %v74_v38 = vld [vmem:[#allocation2 + $0x48] sm:$0xff]  ;;  %v73_v39 = vld [vmem:[#allocation2 + $0x40] sm:$0xff]  ;;  %v1133_v40 = vld [vmem:[#allocation4 + $0xd8] sm:$0xff] }
  0x19   :  { %197 = vmatpush.msra.mxu1 %v99_v28  ;;  %355 = vmatpush.msra.mxu2 %v1127_v31  ;;  %v90_v41 = vld [vmem:[#allocation2 + $0xc8] sm:$0xff]  ;;  %v71_v42 = vld [vmem:[#allocation2 + $0x30] sm:$0xff]  ;;  %v1135_v43 = vld [vmem:[#allocation4 + $0xc0] sm:$0xff] }
  0x1a   :  { %223 = vmatpush.msra.mxu3 %v91_v17  ;;  %177 = vmatpush.msra.mxu0 %v89_v18  ;;  %v87_v44 = vld [vmem:[#allocation2 + $0xb0] sm:$0xff]  ;;  %v70_v45 = vld [vmem:[#allocation2 + $0x28] sm:$0xff]  ;;  %v68_v46 = vld [vmem:[#allocation2 + $0x18] sm:$0xff] }
  0x1b   :  { %198 = vmatpush.msra.mxu1 %v96_v32  ;;  %356 = vmatpush.msra.mxu2 %v1130_v35  ;;  %v1139_v47 = vld [vmem:[#allocation4 + $0xa8] sm:$0xff]  ;;  %v84_v48 = vld [vmem:[#allocation2 + $0x98] sm:$0xff]  ;;  %v67_v49 = vld [vmem:[#allocation2 + $0x10] sm:$0xff] }
  0x1c   :  { %224 = vmatpush.msra.mxu3 %v88_v21  ;;  %178 = vmatpush.msra.mxu0 %v86_v22  ;;  %v65_v50 = vld [vmem:[#allocation2] sm:$0xff]  ;;  %v1142_v51 = vld [vmem:[#allocation4 + $0x170] sm:$0xff]  ;;  %v1150_v54 = vld [vmem:[#allocation4 + $0x158] sm:$0xff] }
  0x1d   :  { %199 = vmatpush.msra.mxu1 %v93_v36  ;;  %357 = vmatpush.msra.mxu2 %v1133_v40  ;;  %v1144_v52 = vld [vmem:[#allocation4 + $0x90] sm:$0xff]  ;;  %v63_v53 = vld [vmem:[%s1530_s0] sm:$0xff]  ;;  %v128_v57 = vld [vmem:[#allocation4 + $0x78] sm:$0xff] }
  0x1e   :  { %225 = vmatpush.msra.mxu3 %v85_v25  ;;  %179 = vmatpush.msra.mxu0 %v83_v26  ;;  %v81_v55 = vld [vmem:[#allocation2 + $0x80] sm:$0xff]  ;;  %v78_v58 = vld [vmem:[#allocation2 + $0x68] sm:$0xff]  ;;  %v75_v61 = vld [vmem:[#allocation2 + $0x50] sm:$0xff] }
  0x1f   :  { %200 = vmatpush.msra.mxu1 %v90_v41  ;;  %358 = vmatpush.msra.mxu2 %v1135_v43  ;;  %v1154_v56 = vld [vmem:[#allocation4 + $0x140] sm:$0xff]  ;;  %v1158_v59 = vld [vmem:[#allocation4 + $0x128] sm:$0xff]  ;;  %v1162_v62 = vld [vmem:[#allocation4 + $0x110] sm:$0xff] }
  0x20   :  { %226 = vmatpush.msra.mxu3 %v82_v29  ;;  %180 = vmatpush.msra.mxu0 %v80_v30  ;;  %v125_v60 = vld [vmem:[#allocation4 + $0x60] sm:$0xff]  ;;  %v1169_v63 = vld [vmem:[%s1530_s0 + $0x8] sm:$0xff]  ;;  %v1171_v1 = vld [vmem:[#allocation4 + $0xf8] sm:$0xff] }
  0x21   :  { %201 = vmatpush.msra.mxu1 %v87_v44  ;;  %359 = vmatpush.msra.mxu2 %v1139_v47  ;;  %v122_v0 = vld [vmem:[#allocation4 + $0x48] sm:$0xff]  ;;  %v72_v2 = vld [vmem:[#allocation2 + $0x38] sm:$0xff]  ;;  %v1175_v3 = vld [vmem:[#allocation4 + $0xe0] sm:$0xff] }
  0x22   :  { %227 = vmatpush.msra.mxu3 %v79_v33  ;;  %181 = vmatpush.msra.mxu0 %v77_v34  ;;  %v119_v4 = vld [vmem:[#allocation4 + $0x30] sm:$0xff]  ;;  %v69_v5 = vld [vmem:[#allocation2 + $0x20] sm:$0xff]  ;;  %v1181_v6 = vld [vmem:[#allocation4 + $0xc8] sm:$0xff] }
  0x23   :  { %202 = vmatpush.msra.mxu1 %v84_v48  ;;  %360 = vmatpush.msra.mxu2 %v1144_v52  ;;  %v116_v7 = vld [vmem:[#allocation4 + $0x18] sm:$0xff]  ;;  %v66_v8 = vld [vmem:[#allocation2 + $0x8] sm:$0xff]  ;;  %v1185_v9 = vld [vmem:[#allocation4 + $0xb0] sm:$0xff] }
  0x24   :  { %228 = vmatpush.msra.mxu3 %v76_v37  ;;  %182 = vmatpush.msra.mxu0 %v74_v38  ;;  %v113_v10 = vld [vmem:[#allocation4] sm:$0xff]  ;;  %v1189_v11 = vld [vmem:[#allocation4 + $0x98] sm:$0xff]  ;;  %v154_v16 = vld [vmem:[#allocation4 + $0x148] sm:$0xff] }
  0x25   :  { %203 = vmatpush.msra.mxu1 %v81_v55  ;;  %361 = vmatpush.msra.mxu2 %v128_v57  ;;  %v160_v12 = vld [vmem:[#allocation4 + $0x178] sm:$0xff]  ;;  %v1193_v13 = vld [vmem:[#allocation4 + $0x80] sm:$0xff]  ;;  %v1200_v17 = vld [vmem:[#allocation4 + $0x50] sm:$0xff] }
  0x26   :  { %229 = vmatpush.msra.mxu3 %v73_v39  ;;  %183 = vmatpush.msra.mxu0 %v71_v42  ;;  %v157_v14 = vld [vmem:[#allocation4 + $0x160] sm:$0xff]  ;;  %v151_v18 = vld [vmem:[#allocation4 + $0x130] sm:$0xff]  ;;  %v148_v20 = vld [vmem:[#allocation4 + $0x118] sm:$0xff] }
  0x27   :  { %204 = vmatpush.msra.mxu1 %v78_v58  ;;  %362 = vmatpush.msra.mxu2 %v125_v60  ;;  %v1206_v21 = vld [vmem:[#allocation4 + $0x20] sm:$0xff]  ;;  %v142_v25 = vld [vmem:[#allocation4 + $0xe8] sm:$0xff]  ;;  %v139_v26 = vld [vmem:[#allocation4 + $0xd0] sm:$0xff] }
  0x28   :  { %230 = vmatpush.msra.mxu3 %v70_v45  ;;  %184 = vmatpush.msra.mxu0 %v68_v46  ;;  %v145_v22 = vld [vmem:[#allocation4 + $0x100] sm:$0xff]  ;;  %v130_v29 = vld [vmem:[#allocation4 + $0x88] sm:$0xff]  ;;  %v127_v30 = vld [vmem:[#allocation4 + $0x70] sm:$0xff] }
  0x29   :  { %205 = vmatpush.msra.mxu1 %v75_v61  ;;  %363 = vmatpush.msra.mxu2 %v122_v0  ;;  %v1213_v24 = vld [vmem:[%s1531_s1] sm:$0xff]  ;;  %v118_v33 = vld [vmem:[#allocation4 + $0x28] sm:$0xff]  ;;  %v115_v34 = vld [vmem:[#allocation4 + $0x10] sm:$0xff] }
  0x2a   :  { %231 = vmatpush.msra.mxu3 %v67_v49  ;;  %185 = vmatpush.msra.mxu0 %v65_v50  ;;  %v133_v28 = vld [vmem:[#allocation4 + $0xa0] sm:$0xff]  ;;  %v506_v44 = vld [vmem:[#allocation2 + $0x2e8] sm:$0xff]  ;;  %v503_v45 = vld [vmem:[#allocation2 + $0x2d0] sm:$0xff] }
  0x2b   :  { %232 = vmatmul.f32.vlgmr.msra.gmra.mxu3 %v63_v53  ;;  %186 = vmatmul.f32.vlgmr.msra.gmra.mxu0 %v63_v53  ;;  %v121_v32 = vld [vmem:[#allocation4 + $0x40] sm:$0xff]  ;;  %v500_v46 = vld [vmem:[#allocation2 + $0x2b8] sm:$0xff]  ;;  %v494_v50 = vld [vmem:[#allocation2 + $0x288] sm:$0xff] }
  0x2c   :  { %240 = vmatpush.msrb.mxu3 %v1115_v15  ;;  %260 = vmatpush.msrb.mxu0 %v1142_v51  ;;  %v1197_v15 = vld [vmem:[#allocation4 + $0x68] sm:$0xff]  ;;  %v1237_v36 = vld [vmem:[%s1534_s4] sm:$0x7]  ;;  %v504_v55 = vld [vmem:[#allocation2 + $0x2d8] sm:$0xff] }
  0x2d   :  { %206 = vmatpush.msra.mxu1 %v72_v2  ;;  %364 = vmatpush.msra.mxu2 %v119_v4  ;;  %v164_v38 = vperm.slane %v1237_v36, 0  ;;  %v166_v41 = vperm.slane %v1237_v36, 2  ;;  %v497_v49 = vld [vmem:[#allocation2 + $0x2a0] sm:$0xff]  ;;  %v1253_v58 = vld [vmem:[#allocation4 + $0x2d0] sm:$0xff]  ;;  %v502_v61 = vld [vmem:[#allocation2 + $0x2c8] sm:$0xff] }
  0x2e   :  { %241 = vmatpush.msrb.mxu3 %v1118_v19  ;;  %261 = vmatpush.msrb.mxu0 %v1150_v54  ;;  %v1203_v19 = vld [vmem:[#allocation4 + $0x38] sm:$0xff]  ;;  %v485_v2 = vld [vmem:[#allocation2 + $0x240] sm:$0xff] }
  0x2f   :  { %207 = vmatpush.msra.mxu1 %v69_v5  ;;  %365 = vmatpush.msra.mxu2 %v116_v7 }
  0x30   :  { %242 = vmatpush.msrb.mxu3 %v1121_v23  ;;  %262 = vmatpush.msrb.mxu0 %v1154_v56  ;;  %v114_v23 = vld [vmem:[#allocation4 + $0x8] sm:$0xff] }
  0x31   :  { %208 = vmatpush.msra.mxu1 %v66_v8  ;;  %366 = vmatpush.msra.mxu2 %v113_v10  ;;  %v482_v8 = vld [vmem:[#allocation2 + $0x228] sm:$0xff] }
  0x32   :  { %243 = vmatpush.msrb.mxu3 %v1124_v27  ;;  %263 = vmatpush.msrb.mxu0 %v1158_v59  ;;  %v136_v27 = vld [vmem:[#allocation4 + $0xb8] sm:$0xff] }
  0x33   :  { %235 = vmatmul.f32.gmra.mxu3 %v1169_v63  ;;  %189 = vmatmul.f32.gmra.mxu0 %v1169_v63 }
  0x34   :  { %244 = vmatpush.msrb.mxu3 %v1127_v31  ;;  %264 = vmatpush.msrb.mxu0 %v1162_v62  ;;  %v124_v31 = vld [vmem:[#allocation4 + $0x58] sm:$0xff] }
  0x35   :  { %209 = vmatmul.f32.vlgmr.msra.gmra.mxu1 %v63_v53  ;;  %v1250_v53 = vld [vmem:[#allocation4 + $0x2e8] sm:$0xff] }
  0x36   :  { %245 = vmatpush.msrb.mxu3 %v1130_v35  ;;  %265 = vmatpush.msrb.mxu0 %v1171_v1 }
  0x37   :  { %280 = vmatpush.msrb.mxu1 %v160_v12 }
  0x38   :  { %246 = vmatpush.msrb.mxu3 %v1133_v40  ;;  %266 = vmatpush.msrb.mxu0 %v1175_v3 }
  0x39   :  { %281 = vmatpush.msrb.mxu1 %v157_v14 }
  0x3a   :  { %247 = vmatpush.msrb.mxu3 %v1135_v43  ;;  %267 = vmatpush.msrb.mxu0 %v1181_v6 }
  0x3b   :  { %282 = vmatpush.msrb.mxu1 %v154_v16 }
  0x3c   :  { %248 = vmatpush.msrb.mxu3 %v1139_v47  ;;  %268 = vmatpush.msrb.mxu0 %v1185_v9  ;;  %v165_v47 = vperm.slane %v1237_v36, 1  ;;  %v1328_v36 = vld [vmem:[%s1531_s1 + $0x8] sm:$0xff] }
  0x3d   :  { %283 = vmatpush.msrb.mxu1 %v151_v18 }
  0x3e   :  { %249 = vmatpush.msrb.mxu3 %v1144_v52  ;;  %269 = vmatpush.msrb.mxu0 %v1189_v11  ;;  %v508_v52 = vld [vmem:[#allocation2 + $0x2f8] sm:$0xff] }
  0x3f   :  { %284 = vmatpush.msrb.mxu1 %v148_v20 }
  0x40   :  { %250 = vmatpush.msrb.mxu3 %v128_v57  ;;  %270 = vmatpush.msrb.mxu0 %v1193_v13  ;;  %v505_v57 = vld [vmem:[#allocation2 + $0x2e0] sm:$0xff] }
  0x41   :  { %285 = vmatpush.msrb.mxu1 %v145_v22 }
  0x42   :  { %251 = vmatpush.msrb.mxu3 %v125_v60  ;;  %271 = vmatpush.msrb.mxu0 %v1197_v15  ;;  %v501_v60 = vld [vmem:[#allocation2 + $0x2c0] sm:$0xff] }
  0x43   :  { %286 = vmatpush.msrb.mxu1 %v142_v25 }
  0x44   :  { %252 = vmatpush.msrb.mxu3 %v122_v0  ;;  %272 = vmatpush.msrb.mxu0 %v1200_v17 }
  0x45   :  { %212 = vmatmul.f32.gmra.mxu1 %v1169_v63 }
  0x46   :  { %253 = vmatpush.msrb.mxu3 %v119_v4  ;;  %273 = vmatpush.msrb.mxu0 %v1203_v19  ;;  %v499_v4 = vld [vmem:[#allocation2 + $0x2b0] sm:$0xff] }
  0x47   :  { %287 = vmatpush.msrb.mxu1 %v139_v26 }
  0x48   :  { %254 = vmatpush.msrb.mxu3 %v116_v7  ;;  %274 = vmatpush.msrb.mxu0 %v1206_v21  ;;  %v1261_v7 = vld [vmem:[#allocation4 + $0x2a0] sm:$0xff] }
  0x49   :  { %288 = vmatpush.msrb.mxu1 %v136_v27 }
  0x4a   :  { %255 = vmatpush.msrb.mxu3 %v113_v10  ;;  %275 = vmatpush.msrb.mxu0 %v114_v23  ;;  %v496_v10 = vld [vmem:[#allocation2 + $0x298] sm:$0xff] }
  0x4b   :  { %256 = vmatmul.f32.vlgmr.msrb.gmra.mxu3 %v1213_v24  ;;  %276 = vmatmul.f32.vlgmr.msrb.gmra.mxu0 %v1213_v24 }
  0x4c   :  { %371 = vmatpush.msra.mxu3 %v1142_v51  ;;  %391 = vmatpush.msra.mxu0 %v160_v12  ;;  %v507_v51 = vld [vmem:[#allocation2 + $0x2f0] sm:$0xff]  ;;  %v1264_v12 = vld [vmem:[#allocation4 + $0x288] sm:$0xff] }
  0x4d   :  { %289 = vmatpush.msrb.mxu1 %v133_v28  ;;  %592 = vmatpush.msrb.mxu2 %v507_v51  ;;  %v474_v51 = vld [vmem:[#allocation2 + $0x1e8] sm:$0xff] }
  0x4e   :  { %372 = vmatpush.msra.mxu3 %v1150_v54  ;;  %392 = vmatpush.msra.mxu0 %v157_v14  ;;  %v491_v54 = vld [vmem:[#allocation2 + $0x270] sm:$0xff] }
  0x4f   :  { %290 = vmatpush.msrb.mxu1 %v130_v29  ;;  %593 = vmatpush.msrb.mxu2 %v504_v55  ;;  %v479_v14 = vld [vmem:[#allocation2 + $0x210] sm:$0xff] }
  0x50   :  { %373 = vmatpush.msra.mxu3 %v1154_v56  ;;  %393 = vmatpush.msra.mxu0 %v154_v16  ;;  %v493_v16 = vld [vmem:[#allocation2 + $0x280] sm:$0xff] }
  0x51   :  { %291 = vmatpush.msrb.mxu1 %v127_v30  ;;  %594 = vmatpush.msrb.mxu2 %v501_v60  ;;  %v468_v60 = vld [vmem:[#allocation2 + $0x1b8] sm:$0xff] }
  0x52   :  { %374 = vmatpush.msra.mxu3 %v1158_v59  ;;  %394 = vmatpush.msra.mxu0 %v151_v18  ;;  %v488_v59 = vld [vmem:[#allocation2 + $0x258] sm:$0xff]  ;;  %v1267_v18 = vld [vmem:[#allocation4 + $0x270] sm:$0xff] }
  0x53   :  { %292 = vmatpush.msrb.mxu1 %v124_v31 }
  0x54   :  { %375 = vmatpush.msra.mxu3 %v1162_v62  ;;  %395 = vmatpush.msra.mxu0 %v148_v20  ;;  %v1255_v62 = vld [vmem:[#allocation4 + $0x2b8] sm:$0xff]  ;;  %v489_v20 = vld [vmem:[#allocation2 + $0x260] sm:$0xff] }
  0x55   :  { %293 = vmatpush.msrb.mxu1 %v121_v32 }
  0x56   :  { %376 = vmatpush.msra.mxu3 %v1171_v1  ;;  %396 = vmatpush.msra.mxu0 %v145_v22 }
  0x57   :  { %294 = vmatpush.msrb.mxu1 %v118_v33 }
  0x58   :  { %377 = vmatpush.msra.mxu3 %v1175_v3  ;;  %397 = vmatpush.msra.mxu0 %v142_v25  ;;  %v498_v3 = vld [vmem:[#allocation2 + $0x2a8] sm:$0xff]  ;;  %v473_v25 = vld [vmem:[#allocation2 + $0x1e0] sm:$0xff] }
  0x59   :  { %295 = vmatpush.msrb.mxu1 %v115_v34  ;;  %595 = vmatpush.msrb.mxu2 %v498_v3  ;;  %v1297_v3 = vld [vmem:[#allocation4 + $0x198] sm:$0xff] }
  0x5a   :  { %378 = vmatpush.msra.mxu3 %v1181_v6  ;;  %398 = vmatpush.msra.mxu0 %v139_v26  ;;  %v486_v26 = vld [vmem:[#allocation2 + $0x248] sm:$0xff] }
  0x5b   :  { %296 = vmatmul.f32.vlgmr.msrb.gmra.mxu1 %v1213_v24 }
  0x5c   :  { %379 = vmatpush.msra.mxu3 %v1185_v9  ;;  %399 = vmatpush.msra.mxu0 %v136_v27  ;;  %v495_v9 = vld [vmem:[#allocation2 + $0x290] sm:$0xff] }
  0x5d   :  { %569 = vmatpush.msra.mxu1 %v506_v44  ;;  %596 = vmatpush.msrb.mxu2 %v495_v9  ;;  %v487_v27 = vld [vmem:[#allocation2 + $0x250] sm:$0xff]  ;;  %v464_v44 = vld [vmem:[#allocation2 + $0x198] sm:$0xff]  ;;  %v1300_v9 = vld [vmem:[#allocation4 + $0x180] sm:$0xff] }
  0x5e   :  { %380 = vmatpush.msra.mxu3 %v1189_v11  ;;  %400 = vmatpush.msra.mxu0 %v133_v28 }
  0x5f   :  { %570 = vmatpush.msra.mxu1 %v503_v45  ;;  %v477_v45 = vld [vmem:[#allocation2 + $0x200] sm:$0xff] }
  0x60   :  { %381 = vmatpush.msra.mxu3 %v1193_v13  ;;  %401 = vmatpush.msra.mxu0 %v130_v29  ;;  %v1273_v29 = vld [vmem:[#allocation4 + $0x240] sm:$0xff] }
  0x61   :  { %571 = vmatpush.msra.mxu1 %v500_v46  ;;  %v478_v46 = vld [vmem:[#allocation2 + $0x208] sm:$0xff] }
  0x62   :  { %382 = vmatpush.msra.mxu3 %v1197_v15  ;;  %402 = vmatpush.msra.mxu0 %v127_v30  ;;  %v492_v15 = vld [vmem:[#allocation2 + $0x278] sm:$0xff] }
  0x63   :  { %572 = vmatpush.msra.mxu1 %v497_v49  ;;  %597 = vmatpush.msrb.mxu2 %v492_v15 }
  0x64   :  { %383 = vmatpush.msra.mxu3 %v1200_v17  ;;  %403 = vmatpush.msra.mxu0 %v124_v31  ;;  %v470_v31 = vld [vmem:[#allocation2 + $0x1c8] sm:$0xff] }
  0x65   :  { %573 = vmatpush.msra.mxu1 %v494_v50  ;;  %598 = vmatpush.msrb.mxu2 %v489_v20  ;;  %v461_v50 = vld [vmem:[#allocation2 + $0x180] sm:$0xff] }
  0x66   :  { %384 = vmatpush.msra.mxu3 %v1203_v19  ;;  %404 = vmatpush.msra.mxu0 %v121_v32  ;;  %v476_v19 = vld [vmem:[#allocation2 + $0x1f8] sm:$0xff]  ;;  %v483_v32 = vld [vmem:[#allocation2 + $0x230] sm:$0xff] }
  0x67   :  { %574 = vmatpush.msra.mxu1 %v491_v54  ;;  %599 = vmatpush.msrb.mxu2 %v486_v26  ;;  %v1288_v54 = vld [vmem:[#allocation4 + $0x1e0] sm:$0xff] }
  0x68   :  { %385 = vmatpush.msra.mxu3 %v1206_v21  ;;  %405 = vmatpush.msra.mxu0 %v118_v33  ;;  %v490_v21 = vld [vmem:[#allocation2 + $0x268] sm:$0xff]  ;;  %v484_v33 = vld [vmem:[#allocation2 + $0x238] sm:$0xff] }
  0x69   :  { %575 = vmatpush.msra.mxu1 %v488_v59  ;;  %600 = vmatpush.msrb.mxu2 %v483_v32  ;;  %v1291_v59 = vld [vmem:[#allocation4 + $0x1c8] sm:$0xff] }
  0x6a   :  { %386 = vmatpush.msra.mxu3 %v114_v23  ;;  %406 = vmatpush.msra.mxu0 %v115_v34  ;;  %v1270_v23 = vld [vmem:[#allocation4 + $0x258] sm:$0xff]  ;;  %v1278_v34 = vld [vmem:[#allocation4 + $0x228] sm:$0xff] }
  0x6b   :  { %576 = vmatpush.msra.mxu1 %v485_v2 }
  0x6c   :  { %615 = vmatpush.msrb.mxu3 %v508_v52  ;;  %640 = vmatpush.msrb.mxu0 %v1250_v53  ;;  %v475_v52 = vld [vmem:[#allocation2 + $0x1f0] sm:$0xff] }
  0x6d   :  { %577 = vmatpush.msra.mxu1 %v482_v8 }
  0x6e   :  { %616 = vmatpush.msrb.mxu3 %v505_v57  ;;  %641 = vmatpush.msrb.mxu0 %v1253_v58  ;;  %v472_v57 = vld [vmem:[#allocation2 + $0x1d8] sm:$0xff] }
  0x6f   :  { %578 = vmatpush.msra.mxu1 %v479_v14  ;;  %v1306_v14 = vld [vmem:[%s1535_s5] ss:$0 sm:$0xff] }
  0x70   :  { %617 = vmatpush.msrb.mxu3 %v502_v61  ;;  %642 = vmatpush.msrb.mxu0 %v1255_v62  ;;  %v469_v61 = vld [vmem:[#allocation2 + $0x1c0] sm:$0xff] }
  0x71   :  { %579 = vmatpush.msra.mxu1 %v476_v19 }
  0x72   :  { %618 = vmatpush.msrb.mxu3 %v499_v4  ;;  %643 = vmatpush.msrb.mxu0 %v1261_v7  ;;  %v462_v4 = vld [vmem:[#allocation2 + $0x188] sm:$0xff] }
  0x73   :  { %580 = vmatpush.msra.mxu1 %v473_v25 }
  0x74   :  { %619 = vmatpush.msrb.mxu3 %v496_v10  ;;  %644 = vmatpush.msrb.mxu0 %v1264_v12 }
  0x75   :  { %581 = vmatpush.msra.mxu1 %v470_v31 }
  0x76   :  { %620 = vmatpush.msrb.mxu3 %v493_v16  ;;  %645 = vmatpush.msrb.mxu0 %v1267_v18 }
  0x78   :  { %621 = vmatpush.msrb.mxu3 %v490_v21  ;;  %646 = vmatpush.msrb.mxu0 %v1270_v23 }
  0x7a   :  { %622 = vmatpush.msrb.mxu3 %v487_v27  ;;  %647 = vmatpush.msrb.mxu0 %v1273_v29 }
  0x7c   :  { %623 = vmatpush.msrb.mxu3 %v484_v33  ;;  %648 = vmatpush.msrb.mxu0 %v1278_v34 }
  0xa8   :  { %v187_v35 = vpop.f32.mrf.mxu0 }
  0xa9   :  { %v188_v11 = vadd.f32 %v187_v35, %v164_v38  ;;  %v467_v35 = vld [vmem:[#allocation2 + $0x1b0] sm:$0xff] }
  0xaa   :  { %582 = vmatpush.msra.mxu1 %v467_v35 }
  0xac   :  { %583 = vmatpush.msra.mxu1 %v464_v44 }
  0xae   :  { %v1239_v37 = vpop.f32.mrf.mxu3  ;;  %584 = vmatpush.msra.mxu1 %v461_v50 }
  0xaf   :  { %v234_v33 = vadd.f32 %v1239_v37, %v166_v41  ;;  %v1347_v37 = vld [vmem:[#allocation4 + $0x2f8] sm:$0xff] }
  0xb0   :  { %v190_v39 = vpop.f32.mrf.mxu0 }
  0xb1   :  { %v1242_v40 = vadd.f32 %v190_v39, %v164_v38  ;;  %v480_v38 = vld [vmem:[#allocation2 + $0x218] sm:$0xff]  ;;  %v481_v39 = vld [vmem:[#allocation2 + $0x220] sm:$0xff] }
  0xb2   :  { %v210_v48 = vpop.f32.mrf.mxu1  ;;  %601 = vmatpush.msrb.mxu2 %v480_v38  ;;  %624 = vmatpush.msrb.mxu3 %v481_v39 }
  0xb3   :  { %v211_v56 = vadd.f32 %v210_v48, %v165_v47  ;;  %v1285_v48 = vld [vmem:[#allocation4 + $0x1f8] sm:$0xff] }
  0xb4   :  { %602 = vmatpush.msrb.mxu2 %v477_v45  ;;  %625 = vmatpush.msrb.mxu3 %v478_v46 }
  0xb6   :  { %v236_v42 = vpop.f32.mrf.mxu3  ;;  %603 = vmatpush.msrb.mxu2 %v474_v51  ;;  %626 = vmatpush.msrb.mxu3 %v475_v52 }
  0xb7   :  { %v1247_v43 = vadd.f32 %v236_v42, %v166_v41  ;;  %v1282_v42 = vld [vmem:[#allocation4 + $0x210] sm:$0xff]  ;;  %v553_v41 = vld [vmem:[#allocation4 + $0x2d8] sm:$0xff] }
  0xb8   :  { %649 = vmatpush.msrb.mxu0 %v1282_v42  ;;  %627 = vmatpush.msrb.mxu3 %v472_v57 }
  0xba   :  { %650 = vmatpush.msrb.mxu0 %v1285_v48  ;;  %628 = vmatpush.msrb.mxu3 %v469_v61  ;;  %v1372_v61 = vld [vmem:[#allocation4 + $0x238] sm:$0xff] }
  0xbc   :  { %651 = vmatpush.msrb.mxu0 %v1288_v54 }
  0xbe   :  { %652 = vmatpush.msrb.mxu0 %v1291_v59 }
  0xc2   :  { %v213_v1 = vpop.f32.mrf.mxu1 }
  0xc3   :  { %v1259_v6 = vadd.f32 %v213_v1, %v165_v47  ;;  %v466_v1 = vld [vmem:[#allocation2 + $0x1a8] sm:$0xff] }
  0xc4   :  { %629 = vmatpush.msrb.mxu3 %v466_v1  ;;  %v1378_v1 = vld [vmem:[#allocation4 + $0x208] sm:$0xff] }
  0xc8   :  { %v277_v63 = vpop.f32.mrf.mxu0 }
  0xc9   :  { %v320_v0 = vadd.f32 %v277_v63, %v211_v56  ;;  %v471_v56 = vld [vmem:[#allocation2 + $0x1d0] sm:$0xff] }
  0xca   :  { %604 = vmatpush.msrb.mxu2 %v471_v56  ;;  %v1294_v63 = vld [vmem:[#allocation4 + $0x1b0] sm:$0xff] }
  0xcb   :  { %v937_v5 = vmul.f32 -1.442695, %v320_v0  ;;  %v465_v0 = vld [vmem:[#allocation2 + $0x1a0] sm:$0xff]  ;;  %653 = vmatpush.msrb.mxu0 %v1294_v63 }
  0xcc   :  { %605 = vmatpush.msrb.mxu2 %v468_v60  ;;  %v1369_v60 = vld [vmem:[#allocation4 + $0x250] sm:$0xff] }
  0xcd   :  { %955 = vpow2.f32 %v937_v5  ;;  %v463_v5 = vld [vmem:[#allocation2 + $0x190] sm:$0xff]  ;;  %654 = vmatpush.msrb.mxu0 %v1297_v3 }
  0xce   :  { %v257_v13 = vpop.f32.mrf.mxu3  ;;  %606 = vmatpush.msrb.mxu2 %v465_v0  ;;  %630 = vmatpush.msrb.mxu3 %v463_v5  ;;  %v526_v0 = vld [vmem:[#allocation4 + $0x200] sm:$0xff] }
  0xcf   :  { %v300_v17 = vadd.f32 %v257_v13, %v188_v11  ;;  %655 = vmatpush.msrb.mxu0 %v1300_v9 }
  0xd0   :  { %607 = vmatpush.msrb.mxu2 %v462_v4  ;;  %v1381_v4 = vld [vmem:[#allocation4 + $0x1f0] sm:$0xff] }
  0xd1   :  { %v936_v22 = vmul.f32 -1.442695, %v300_v17 }
  0xd3   :  { %v956_v28 = vpop.eup %955  ;;  %957 = vpow2.f32 %v936_v22 }
  0xd4   :  { %v1275_v30 = vadd.f32 1.0, %v956_v28 }
  0xd6   :  { %959 = vrcp.f32 %v1275_v30  ;;  %vm330_vm2 = vweird.f32 %v1275_v30  ;;  %v336_v26 = vand.u32 2147483648, %v1275_v30  ;;  %v334_v31 = vand.u32 2147483647, %v1275_v30 }
  0xd8   :  { %v297_v15 = vpop.f32.mrf.mxu1  ;;  %v337_v38 = vor.u32 1.1754944e-38, %v336_v26  ;;  %vm335_vm7 = vcmp.eq.f32.partialorder %v334_v31, 8.507059e+37 }
  0xd9   :  { %v958_v47 = vpop.eup %957  ;;  %v343_v22 = vadd.f32 %v1306_v14, %v297_v15  ;;  %v1391_v15 = vld [vmem:[#allocation4 + $0x1c0] sm:$0xff] }
  0xda   :  { %v304_v49 = vadd.f32 1.0, %v958_v47 }
  0xdc   :  { %961 = vrcp.f32 %v304_v49  ;;  %v960_v55 = vpop.eup %959  ;;  %v316_v16 = vand.u32 2147483648, %v304_v49  ;;  %v314_v19 = vand.u32 2147483647, %v304_v49  ;;  %vm310_vm1 = vweird.f32 %v304_v49 }
  0xdd   :  { %v326_v2 = vmul.f32 %v960_v55, %v1275_v30  ;;  %vm331_vm3 = vweird.f32 %v960_v55  ;;  %v1361_v30 = vld [vmem:[#allocation4 + $0x280] sm:$0xff] }
  0xde   :  { %v317_v25 = vor.u32 1.1754944e-38, %v316_v16  ;;  %vm315_vm5 = vcmp.eq.f32.partialorder %v314_v19, 8.507059e+37  ;;  %vm332_vm6 = vmor %vm330_vm2, %vm331_vm3  ;;  %v514_v16 = vld [vmem:[#allocation4 + $0x1a0] sm:$0xff]  ;;  %v511_v19 = vld [vmem:[#allocation4 + $0x188] sm:$0xff] }
  0xdf   :  { %v327_v11 = vsub.f32 1.0, %v326_v2 }
  0xe1   :  { %v328_v20 = vmul.f32 %v960_v55, %v327_v11  ;;  %v1388_v11 = vld [vmem:[#allocation4 + $0x1d8] sm:$0xff] }
  0xe2   :  { %v962_v8 = vpop.eup %961 }
  0xe3   :  { %v306_v10 = vmul.f32 %v962_v8, %v304_v49  ;;  %vm311_vm0 = vweird.f32 %v962_v8  ;;  %v329_v28 = vadd.f32 %v960_v55, %v328_v20  ;;  %v1396_v20 = vld [vmem:[#allocation4 + $0x190] sm:$0xff] }
  0xe4   :  { %vm312_vm4 = vmor %vm310_vm1, %vm311_vm0 }
  0xe5   :  { %v307_v13 = vsub.f32 1.0, %v306_v10  ;;  %v333_v44 = vsel %vm332_vm6, %v960_v55, %v329_v28  ;;  %v1366_v55 = vld [vmem:[#allocation4 + $0x268] sm:$0xff]  ;;  %v520_v10 = vld [vmem:[#allocation4 + $0x1d0] sm:$0xff] }
  0xe6   :  { %v338_v45 = vsel %vm335_vm7, %v337_v38, %v333_v44 }
  0xe7   :  { %v308_v17 = vmul.f32 %v962_v8, %v307_v13  ;;  %v347_v46 = vsub.f32 1.0, %v338_v45  ;;  %v349_v50 = vmul.f32 %v338_v45, %v1213_v24  ;;  %v556_v24 = vld [vmem:[#allocation4 + $0x2f0] sm:$0xff]  ;;  %v517_v13 = vld [vmem:[#allocation4 + $0x1b8] sm:$0xff] }
  0xe8   :  { %660 = vmatpush.msrb.mxu1 %v556_v24 }
  0xe9   :  { %v309_v21 = vadd.f32 %v962_v8, %v308_v17  ;;  %v1393_v17 = vld [vmem:[#allocation4 + $0x1a8] sm:$0xff] }
  0xea   :  { %661 = vmatpush.msrb.mxu1 %v553_v41 }
  0xeb   :  { %v313_v27 = vsel %vm312_vm4, %v962_v8, %v309_v21 }
  0xec   :  { %v318_v32 = vsel %vm315_vm5, %v317_v25, %v313_v27 }
  0xed   :  { %v344_v35 = vmul.f32 %v343_v22, %v318_v32 }
  0xef   :  { %v345_v39 = vadd.f32 %v344_v35, %v234_v33 }
  0xf1   :  { %963 = vtanh.f32 %v345_v39 }
  0xf7   :  { %v964_v47 = vpop.eup %963 }
  0xf8   :  { %v348_v49 = vmul.f32 %v964_v47, %v347_v46 }
  0xfa   :  { %v1317_v51 = vadd.f32 %v349_v50, %v348_v49 }
  0xfc   :  { %367 = vmatmul.f32.vlgmr.msra.gmra.mxu2 %v1317_v51  ;;  %387 = vmatmul.f32.vlgmr.msra.gmra.mxu3 %v1317_v51 }
  0xfd   :  { %407 = vmatmul.f32.vlgmr.msra.gmra.mxu0 %v1317_v51  ;;  %585 = vmatmul.f32.vlgmr.msra.gmra.mxu1 %v1317_v51 }
  0xfe   :  { %751 = vmatpush.msra.mxu3 %v1250_v53  ;;  %680 = vmatpush.msra.mxu2 %v1347_v37  ;;  %v1350_v53 = vld [vmem:[#allocation4 + $0x2e0] sm:$0xff] }
  0xff   :  { %771 = vmatpush.msra.mxu0 %v556_v24 }
 0x100   :  { %752 = vmatpush.msra.mxu3 %v1253_v58  ;;  %681 = vmatpush.msra.mxu2 %v1350_v53  ;;  %v550_v58 = vld [vmem:[#allocation4 + $0x2c0] sm:$0xff] }
 0x101   :  { %772 = vmatpush.msra.mxu0 %v553_v41  ;;  %662 = vmatpush.msrb.mxu1 %v550_v58 }
 0x102   :  { %753 = vmatpush.msra.mxu3 %v1255_v62  ;;  %v1353_v62 = vld [vmem:[#allocation4 + $0x2c8] sm:$0xff] }
 0x103   :  { %682 = vmatpush.msra.mxu2 %v1353_v62  ;;  %773 = vmatpush.msra.mxu0 %v550_v58 }
 0x104   :  { %608 = vmatmul.f32.vlgmr.msrb.gmra.mxu2 %v1317_v51  ;;  %631 = vmatmul.f32.vlgmr.msrb.gmra.mxu3 %v1317_v51 }
 0x105   :  { %656 = vmatmul.f32.vlgmr.msrb.gmra.mxu0 %v1328_v36  ;;  %754 = vmatpush.msra.mxu3 %v1261_v7  ;;  %v547_v7 = vld [vmem:[#allocation4 + $0x2a8] sm:$0xff] }
 0x106   :  { %663 = vmatpush.msrb.mxu1 %v547_v7  ;;  %774 = vmatpush.msra.mxu0 %v547_v7 }
 0x107   :  { %755 = vmatpush.msra.mxu3 %v1264_v12  ;;  %v1356_v12 = vld [vmem:[#allocation4 + $0x2b0] sm:$0xff] }
 0x108   :  { %683 = vmatpush.msra.mxu2 %v1356_v12 }
 0x109   :  { %756 = vmatpush.msra.mxu3 %v1267_v18  ;;  %v544_v18 = vld [vmem:[#allocation4 + $0x290] sm:$0xff] }
 0x10a   :  { %664 = vmatpush.msrb.mxu1 %v544_v18  ;;  %775 = vmatpush.msra.mxu0 %v544_v18 }
 0x10b   :  { %757 = vmatpush.msra.mxu3 %v1270_v23  ;;  %v1359_v23 = vld [vmem:[#allocation4 + $0x298] sm:$0xff] }
 0x10c   :  { %684 = vmatpush.msra.mxu2 %v1359_v23 }
 0x10d   :  { %758 = vmatpush.msra.mxu3 %v1273_v29  ;;  %v541_v29 = vld [vmem:[#allocation4 + $0x278] sm:$0xff] }
 0x10e   :  { %665 = vmatpush.msrb.mxu1 %v541_v29  ;;  %685 = vmatpush.msra.mxu2 %v1361_v30 }
 0x10f   :  { %759 = vmatpush.msra.mxu3 %v1278_v34  ;;  %776 = vmatpush.msra.mxu0 %v541_v29 }
 0x110   :  { %686 = vmatpush.msra.mxu2 %v1366_v55 }
 0x111   :  { %760 = vmatpush.msra.mxu3 %v1282_v42 }
 0x112   :  { %687 = vmatpush.msra.mxu2 %v1369_v60 }
 0x113   :  { %761 = vmatpush.msra.mxu3 %v1285_v48 }
 0x114   :  { %688 = vmatpush.msra.mxu2 %v1372_v61 }
 0x115   :  { %762 = vmatpush.msra.mxu3 %v1288_v54  ;;  %v538_v54 = vld [vmem:[#allocation4 + $0x260] sm:$0xff] }
 0x116   :  { %666 = vmatpush.msrb.mxu1 %v538_v54  ;;  %777 = vmatpush.msra.mxu0 %v538_v54  ;;  %v875_v54 = vld [vmem:[%s1536_s6 + $0x70] sm:$0xff] }
 0x117   :  { %763 = vmatpush.msra.mxu3 %v1291_v59  ;;  %v535_v59 = vld [vmem:[#allocation4 + $0x248] sm:$0xff] }
 0x118   :  { %667 = vmatpush.msrb.mxu1 %v535_v59  ;;  %778 = vmatpush.msra.mxu0 %v535_v59  ;;  %v872_v59 = vld [vmem:[%s1536_s6 + $0x58] sm:$0xff] }
 0x119   :  { %764 = vmatpush.msra.mxu3 %v1294_v63  ;;  %v1375_v63 = vld [vmem:[#allocation4 + $0x220] sm:$0xff] }
 0x11a   :  { %689 = vmatpush.msra.mxu2 %v1375_v63 }
 0x11b   :  { %765 = vmatpush.msra.mxu3 %v1297_v3  ;;  %v523_v3 = vld [vmem:[#allocation4 + $0x1e8] sm:$0xff] }
 0x11c   :  { %690 = vmatpush.msra.mxu2 %v1378_v1 }
 0x11d   :  { %766 = vmatpush.msra.mxu3 %v1300_v9 }
 0x11e   :  { %691 = vmatpush.msra.mxu2 %v1381_v4 }
 0x120   :  { %692 = vmatpush.msra.mxu2 %v1388_v11 }
 0x122   :  { %693 = vmatpush.msra.mxu2 %v1391_v15 }
 0x124   :  { %694 = vmatpush.msra.mxu2 %v1393_v17 }
 0x126   :  { %695 = vmatpush.msra.mxu2 %v1396_v20 }
 0x17a   :  { %v408_v35 = vpop.f32.mrf.mxu0  ;;  %v586_v29 = vpop.f32.mrf.mxu1 }
 0x17b   :  { %v451_v45 = vadd.f32 %v1306_v14, %v408_v35 }
 0x17f   :  { %v368_v34 = vpop.f32.mrf.mxu2  ;;  %v388_v42 = vpop.f32.mrf.mxu3 }
 0x180   :  { %v411_v48 = vadd.f32 %v368_v34, %v1242_v40  ;;  %v431_v52 = vadd.f32 %v388_v42, %v1259_v6  ;;  %v532_v40 = vld [vmem:[#allocation4 + $0x230] sm:$0xff]  ;;  %v529_v6 = vld [vmem:[#allocation4 + $0x218] sm:$0xff] }
 0x181   :  { %668 = vmatpush.msrb.mxu1 %v532_v40  ;;  %779 = vmatpush.msra.mxu0 %v532_v40  ;;  %v871_v40 = vld [vmem:[%s1536_s6 + $0x50] sm:$0xff] }
 0x182   :  { %v938_v56 = vmul.f32 -1.442695, %v411_v48  ;;  %v939_v57 = vmul.f32 -1.442695, %v431_v52  ;;  %v876_v52 = vld [vmem:[%s1536_s6 + $0x78] sm:$0xff] }
 0x183   :  { %669 = vmatpush.msrb.mxu1 %v529_v6  ;;  %780 = vmatpush.msra.mxu0 %v529_v6  ;;  %v869_v6 = vld [vmem:[%s1536_s6 + $0x40] sm:$0xff] }
 0x184   :  { %965 = vpow2.f32 %v938_v56  ;;  %881 = vmatpush.msrb.mxu2 %v876_v52  ;;  %v873_v56 = vld [vmem:[%s1536_s6 + $0x60] sm:$0xff] }
 0x185   :  { %967 = vpow2.f32 %v939_v57  ;;  %670 = vmatpush.msrb.mxu1 %v526_v0  ;;  %781 = vmatpush.msra.mxu0 %v526_v0 }
 0x186   :  { %882 = vmatpush.msrb.mxu2 %v875_v54 }
 0x187   :  { %671 = vmatpush.msrb.mxu1 %v523_v3  ;;  %782 = vmatpush.msra.mxu0 %v523_v3 }
 0x189   :  { %672 = vmatpush.msrb.mxu1 %v520_v10  ;;  %783 = vmatpush.msra.mxu0 %v520_v10 }
 0x18a   :  { %v966_v2 = vpop.eup %965 }
 0x18b   :  { %v968_v5 = vpop.eup %967  ;;  %v415_v8 = vadd.f32 1.0, %v966_v2  ;;  %673 = vmatpush.msrb.mxu1 %v517_v13  ;;  %784 = vmatpush.msra.mxu0 %v517_v13  ;;  %v867_v2 = vld [vmem:[%s1536_s6 + $0x30] sm:$0xff] }
 0x18c   :  { %v1384_v9 = vadd.f32 1.0, %v968_v5  ;;  %v866_v5 = vld [vmem:[%s1536_s6 + $0x28] sm:$0xff] }
 0x18d   :  { %969 = vrcp.f32 %v415_v8  ;;  %674 = vmatpush.msrb.mxu1 %v514_v16  ;;  %785 = vmatpush.msra.mxu0 %v514_v16  ;;  %v427_v28 = vand.u32 2147483648, %v415_v8  ;;  %v425_v33 = vand.u32 2147483647, %v415_v8  ;;  %vm421_vm9 = vweird.f32 %v415_v8 }
 0x18e   :  { %971 = vrcp.f32 %v1384_v9  ;;  %v447_v50 = vand.u32 2147483648, %v1384_v9  ;;  %vm441_vm13 = vweird.f32 %v1384_v9 }
 0x18f   :  { %675 = vmatpush.msrb.mxu1 %v511_v19  ;;  %786 = vmatpush.msra.mxu0 %v511_v19  ;;  %v428_v44 = vor.u32 1.1754944e-38, %v427_v28  ;;  %vm426_vm11 = vcmp.eq.f32.partialorder %v425_v33, 8.507059e+37  ;;  %v862_v19 = vld [vmem:[%s1536_s6 + $0x8] sm:$0xff] }
 0x191   :  { %791 = vmatpush.msra.mxu1 %v1347_v37  ;;  %v445_v37 = vand.u32 2147483647, %v1384_v9 }
 0x193   :  { %v970_v21 = vpop.eup %969  ;;  %792 = vmatpush.msra.mxu1 %v1350_v53  ;;  %v448_v53 = vor.u32 1.1754944e-38, %v447_v50  ;;  %vm446_vm15 = vcmp.eq.f32.partialorder %v445_v37, 8.507059e+37 }
 0x194   :  { %v972_v22 = vpop.eup %971  ;;  %v417_v25 = vmul.f32 %v970_v21, %v415_v8  ;;  %vm422_vm8 = vweird.f32 %v970_v21  ;;  %v865_v8 = vld [vmem:[%s1536_s6 + $0x20] sm:$0xff] }
 0x195   :  { %v437_v26 = vmul.f32 %v972_v22, %v1384_v9  ;;  %793 = vmatpush.msra.mxu1 %v1353_v62  ;;  %vm423_vm10 = vmor %vm421_vm9, %vm422_vm8  ;;  %vm442_vm12 = vweird.f32 %v972_v22 }
 0x196   :  { %v418_v27 = vsub.f32 1.0, %v417_v25  ;;  %vm443_vm14 = vmor %vm441_vm13, %vm442_vm12 }
 0x197   :  { %v438_v31 = vsub.f32 1.0, %v437_v26  ;;  %794 = vmatpush.msra.mxu1 %v1356_v12 }
 0x198   :  { %v419_v32 = vmul.f32 %v970_v21, %v418_v27  ;;  %v1492_v27 = vld [vmem:[%s1535_s5 + $0x1] ss:$0 sm:$0xff] }
 0x199   :  { %v439_v38 = vmul.f32 %v972_v22, %v438_v31  ;;  %795 = vmatpush.msra.mxu1 %v1359_v23 }
 0x19a   :  { %v420_v39 = vadd.f32 %v970_v21, %v419_v32 }
 0x19b   :  { %v440_v49 = vadd.f32 %v972_v22, %v439_v38  ;;  %796 = vmatpush.msra.mxu1 %v1361_v30  ;;  %v657_v30 = vpop.f32.mrf.mxu0 }
 0x19c   :  { %v424_v46 = vsel %vm423_vm10, %v970_v21, %v420_v39 }
 0x19d   :  { %v429_v47 = vsel %vm426_vm11, %v428_v44, %v424_v46  ;;  %v444_v14 = vsel %vm443_vm14, %v972_v22, %v440_v49  ;;  %797 = vmatpush.msra.mxu1 %v1366_v55  ;;  %v874_v55 = vld [vmem:[%s1536_s6 + $0x68] sm:$0xff]  ;;  %v861_v22 = vld [vmem:[%s1536_s6] sm:$0xff]  ;;  %v632_v46 = vpop.f32.mrf.mxu3 }
 0x19e   :  { %v452_v24 = vmul.f32 %v451_v45, %v429_v47  ;;  %v449_v58 = vsel %vm446_vm15, %v448_v53, %v444_v14  ;;  %883 = vmatpush.msrb.mxu2 %v874_v55 }
 0x19f   :  { %798 = vmatpush.msra.mxu1 %v1369_v60  ;;  %v455_v62 = vsub.f32 1.0, %v449_v58 }
 0x1a0   :  { %v453_v41 = vadd.f32 %v452_v24, %v1247_v43  ;;  %v457_v43 = vmul.f32 %v449_v58, %v1317_v51  ;;  %v1431_v51 = vld [vmem:[%s1534_s4 + $0x3] sm:$0x7]  ;;  %884 = vmatpush.msrb.mxu2 %v873_v56 }
 0x1a1   :  { %799 = vmatpush.msra.mxu1 %v1372_v61  ;;  %v563_v23 = vperm.slane %v1431_v51, 0  ;;  %v870_v61 = vld [vmem:[%s1536_s6 + $0x48] sm:$0xff]  ;;  %v565_v45 = vperm.slane %v1431_v51, 2 }
 0x1a2   :  { %973 = vtanh.f32 %v453_v41  ;;  %885 = vmatpush.msrb.mxu2 %v872_v59 }
 0x1a3   :  { %800 = vmatpush.msra.mxu1 %v1375_v63  ;;  %v587_v34 = vadd.f32 %v586_v29, %v563_v23  ;;  %v868_v63 = vld [vmem:[%s1536_s6 + $0x38] sm:$0xff]  ;;  %v633_v24 = vadd.f32 %v632_v46, %v565_v45 }
 0x1a4   :  { %886 = vmatpush.msrb.mxu2 %v871_v40 }
 0x1a5   :  { %801 = vmatpush.msra.mxu1 %v1378_v1  ;;  %v700_v42 = vadd.f32 %v657_v30, %v587_v34  ;;  %v609_v1 = vpop.f32.mrf.mxu2 }
 0x1a6   :  { %887 = vmatpush.msrb.mxu2 %v870_v61 }
 0x1a7   :  { %802 = vmatpush.msra.mxu1 %v1381_v4  ;;  %v943_v48 = vmul.f32 -1.442695, %v700_v42  ;;  %v564_v4 = vperm.slane %v1431_v51, 1 }
 0x1a8   :  { %v974_v7 = vpop.eup %973  ;;  %888 = vmatpush.msrb.mxu2 %v869_v6 }
 0x1a9   :  { %v456_v12 = vmul.f32 %v974_v7, %v455_v62  ;;  %803 = vmatpush.msra.mxu1 %v1388_v11  ;;  %975 = vpow2.f32 %v943_v48  ;;  %v610_v10 = vadd.f32 %v609_v1, %v564_v4  ;;  %v864_v11 = vld [vmem:[%s1536_s6 + $0x18] sm:$0xff] }
 0x1aa   :  { %889 = vmatpush.msrb.mxu2 %v868_v63 }
 0x1ab   :  { %v458_v18 = vadd.f32 %v457_v43, %v456_v12  ;;  %804 = vmatpush.msra.mxu1 %v1391_v15 }
 0x1ac   :  { %890 = vmatpush.msrb.mxu2 %v867_v2 }
 0x1ad   :  { %459 = vst [vmem:[%s1539_s9] sm:$0xff] %v458_v18  ;;  %588 = vmatmul.f32.gmra.mxu1 %v458_v18  ;;  %611 = vmatmul.f32.gmra.mxu2 %v458_v18 }
 0x1ae   :  { %634 = vmatmul.f32.gmra.mxu3 %v458_v18  ;;  %805 = vmatpush.msra.mxu1 %v1393_v17  ;;  %v863_v17 = vld [vmem:[%s1536_s6 + $0x10] sm:$0xff] }
 0x1af   :  { %v976_v57 = vpop.eup %975  ;;  %891 = vmatpush.msrb.mxu2 %v866_v5 }
 0x1b0   :  { %806 = vmatpush.msra.mxu1 %v1396_v20  ;;  %v704_v60 = vadd.f32 1.0, %v976_v57 }
 0x1b1   :  { %892 = vmatpush.msrb.mxu2 %v865_v8 }
 0x1b2   :  { %977 = vrcp.f32 %v704_v60  ;;  %v716_v32 = vand.u32 2147483648, %v704_v60  ;;  %vm710_vm1 = vweird.f32 %v704_v60  ;;  %v714_v35 = vand.u32 2147483647, %v704_v60 }
 0x1b3   :  { %893 = vmatpush.msrb.mxu2 %v864_v11 }
 0x1b4   :  { %v717_v44 = vor.u32 1.1754944e-38, %v716_v32  ;;  %vm715_vm3 = vcmp.eq.f32.partialorder %v714_v35, 8.507059e+37 }
 0x1b5   :  { %676 = vmatmul.f32.vlgmr.msrb.gmra.mxu1 %v1328_v36  ;;  %696 = vmatmul.f32.vlgmr.msra.gmra.mxu2 %v1328_v36 }
 0x1b6   :  { %894 = vmatpush.msrb.mxu2 %v863_v17 }
 0x1b8   :  { %v978_v3 = vpop.eup %977  ;;  %895 = vmatpush.msrb.mxu2 %v862_v19 }
 0x1b9   :  { %v706_v9 = vmul.f32 %v978_v3, %v704_v60  ;;  %vm711_vm0 = vweird.f32 %v978_v3 }
 0x1ba   :  { %896 = vmatpush.msrb.mxu2 %v861_v22  ;;  %vm712_vm2 = vmor %vm710_vm1, %vm711_vm0 }
 0x1bb   :  { %v707_v20 = vsub.f32 1.0, %v706_v9 }
 0x1bd   :  { %v708_v25 = vmul.f32 %v978_v3, %v707_v20 }
 0x1bf   :  { %v709_v26 = vadd.f32 %v978_v3, %v708_v25 }
 0x1c1   :  { %v713_v38 = vsel %vm712_vm2, %v978_v3, %v709_v26 }
 0x1c2   :  { %v718_v47 = vsel %vm715_vm3, %v717_v44, %v713_v38 }
 0x22a   :  { %v1463_v0 = vpop.f32.mrf.mxu1 }
 0x22b   :  { %v590_v59 = vadd.f32 %v1463_v0, %v563_v23 }
 0x230   :  { %v612_v15 = vpop.f32.mrf.mxu2 }
 0x231   :  { %v635_v52 = vpop.f32.mrf.mxu3  ;;  %v613_v54 = vadd.f32 %v612_v15, %v564_v4 }
 0x232   :  { %v677_v13 = vpop.f32.mrf.mxu1 }
 0x233   :  { %v720_v16 = vadd.f32 %v677_v13, %v610_v10 }
 0x235   :  { %v944_v21 = vmul.f32 -1.442695, %v720_v16 }
 0x237   :  { %979 = vpow2.f32 %v944_v21 }
 0x238   :  { %v697_v31 = vpop.f32.mrf.mxu2 }
 0x239   :  { %v743_v39 = vadd.f32 %v1492_v27, %v697_v31 }
 0x23b   :  { %v744_v49 = vmul.f32 %v743_v39, %v718_v47 }
 0x23d   :  { %v980_v28 = vpop.eup %979  ;;  %v745_v41 = vadd.f32 %v744_v49, %v633_v24 }
 0x23e   :  { %v724_v33 = vadd.f32 1.0, %v980_v28  ;;  %v636_v28 = vadd.f32 %v635_v52, %v565_v45 }
 0x240   :  { %981 = vrcp.f32 %v724_v33  ;;  %v736_v53 = vand.u32 2147483648, %v724_v33  ;;  %v734_v62 = vand.u32 2147483647, %v724_v33  ;;  %vm730_vm5 = vweird.f32 %v724_v33 }
 0x241   :  { %983 = vtanh.f32 %v745_v41 }
 0x242   :  { %v737_v12 = vor.u32 1.1754944e-38, %v736_v53  ;;  %vm735_vm7 = vcmp.eq.f32.partialorder %v734_v62, 8.507059e+37 }
 0x246   :  { %v982_v50 = vpop.eup %981 }
 0x247   :  { %v726_v37 = vmul.f32 %v982_v50, %v724_v33  ;;  %vm731_vm4 = vweird.f32 %v982_v50  ;;  %v984_v30 = vpop.eup %983 }
 0x248   :  { %vm732_vm6 = vmor %vm730_vm5, %vm731_vm4 }
 0x249   :  { %v727_v14 = vsub.f32 1.0, %v726_v37 }
 0x24b   :  { %v728_v58 = vmul.f32 %v982_v50, %v727_v14 }
 0x24d   :  { %v729_v7 = vadd.f32 %v982_v50, %v728_v58 }
 0x24f   :  { %v733_v43 = vsel %vm732_vm6, %v982_v50, %v729_v7 }
 0x250   :  { %v738_v18 = vsel %vm735_vm7, %v737_v12, %v733_v43 }
 0x251   :  { %v747_v29 = vsub.f32 1.0, %v738_v18  ;;  %v749_v42 = vmul.f32 %v1328_v36, %v738_v18  ;;  %v1510_v36 = vld [vmem:[%s1537_s7] ss:$0 sm:$0xff] }
 0x253   :  { %v748_v34 = vmul.f32 %v984_v30, %v747_v29 }
 0x255   :  { %v1499_v48 = vadd.f32 %v749_v42, %v748_v34 }
 0x257   :  { %767 = vmatmul.f32.vlgmr.msra.gmra.mxu3 %v1499_v48  ;;  %787 = vmatmul.f32.vlgmr.msra.gmra.mxu0 %v1499_v48 }
 0x258   :  { %807 = vmatmul.f32.vlgmr.msra.gmra.mxu1 %v1499_v48  ;;  %897 = vmatmul.f32.vlgmr.msrb.gmra.mxu2 %v1499_v48 }
 0x2d4   :  { %v788_v55 = vpop.f32.mrf.mxu0 }
 0x2d5   :  { %v831_v56 = vadd.f32 %v788_v55, %v613_v54  ;;  %v808_v16 = vpop.f32.mrf.mxu1 }
 0x2d6   :  { %v851_v21 = vadd.f32 %v1492_v27, %v808_v16 }
 0x2d7   :  { %v946_v57 = vmul.f32 -1.442695, %v831_v56 }
 0x2d9   :  { %985 = vpow2.f32 %v946_v57 }
 0x2da   :  { %v768_v60 = vpop.f32.mrf.mxu3 }
 0x2db   :  { %v811_v40 = vadd.f32 %v768_v60, %v590_v59  ;;  %v898_v61 = vpop.f32.mrf.mxu2 }
 0x2dc   :  { %v899_v6 = vadd.f32 %v1510_v36, %v898_v61 }
 0x2dd   :  { %v945_v63 = vmul.f32 -1.442695, %v811_v40 }
 0x2de   :  { %904 = vmax.xlane.f32.xlu0 %v899_v6 }
 0x2df   :  { %v986_v1 = vpop.eup %985  ;;  %987 = vpow2.f32 %v945_v63 }
 0x2e0   :  { %v835_v2 = vadd.f32 1.0, %v986_v1 }
 0x2e2   :  { %989 = vrcp.f32 %v835_v2  ;;  %v847_v31 = vand.u32 2147483648, %v835_v2  ;;  %vm841_vm13 = vweird.f32 %v835_v2  ;;  %v845_v33 = vand.u32 2147483647, %v835_v2 }
 0x2e4   :  { %v848_v39 = vor.u32 1.1754944e-38, %v847_v31  ;;  %vm846_vm15 = vcmp.eq.f32.partialorder %v845_v33, 8.507059e+37 }
 0x2e5   :  { %v988_v3 = vpop.eup %987 }
 0x2e6   :  { %v815_v4 = vadd.f32 1.0, %v988_v3 }
 0x2e8   :  { %991 = vrcp.f32 %v815_v4  ;;  %v990_v5 = vpop.eup %989  ;;  %v827_v11 = vand.u32 2147483648, %v815_v4  ;;  %v825_v15 = vand.u32 2147483647, %v815_v4  ;;  %vm821_vm9 = vweird.f32 %v815_v4 }
 0x2e9   :  { %v837_v8 = vmul.f32 %v990_v5, %v835_v2  ;;  %vm842_vm12 = vweird.f32 %v990_v5 }
 0x2ea   :  { %v828_v20 = vor.u32 1.1754944e-38, %v827_v11  ;;  %vm826_vm11 = vcmp.eq.f32.partialorder %v825_v15, 8.507059e+37  ;;  %vm843_vm14 = vmor %vm841_vm13, %vm842_vm12 }
 0x2eb   :  { %v838_v23 = vsub.f32 1.0, %v837_v8 }
 0x2ed   :  { %v839_v17 = vmul.f32 %v990_v5, %v838_v23 }
 0x2ee   :  { %v992_v9 = vpop.eup %991 }
 0x2ef   :  { %v817_v10 = vmul.f32 %v992_v9, %v815_v4  ;;  %vm822_vm8 = vweird.f32 %v992_v9  ;;  %v840_v26 = vadd.f32 %v990_v5, %v839_v17 }
 0x2f0   :  { %vm823_vm10 = vmor %vm821_vm9, %vm822_vm8 }
 0x2f1   :  { %v818_v0 = vsub.f32 1.0, %v817_v10  ;;  %v844_v38 = vsel %vm843_vm14, %v990_v5, %v840_v26 }
 0x2f2   :  { %v849_v44 = vsel %vm846_vm15, %v848_v39, %v844_v38 }
 0x2f3   :  { %v819_v13 = vmul.f32 %v992_v9, %v818_v0  ;;  %v855_v27 = vsub.f32 1.0, %v849_v44  ;;  %v857_v49 = vmul.f32 %v849_v44, %v1499_v48 }
 0x2f5   :  { %v820_v19 = vadd.f32 %v992_v9, %v819_v13 }
 0x2f7   :  { %v824_v22 = vsel %vm823_vm10, %v992_v9, %v820_v19 }
 0x2f8   :  { %v829_v25 = vsel %vm826_vm11, %v828_v20, %v824_v22 }
 0x2f9   :  { %v852_v32 = vmul.f32 %v851_v21, %v829_v25 }
 0x2fb   :  { %v853_v35 = vadd.f32 %v852_v32, %v636_v28 }
 0x2fd   :  { %993 = vtanh.f32 %v853_v35 }
 0x303   :  { %v994_v46 = vpop.eup %993 }
 0x304   :  { %v856_v47 = vmul.f32 %v994_v46, %v855_v27 }
 0x306   :  { %v858_v50 = vadd.f32 %v857_v49, %v856_v47 }
 0x308   :  { %947 = vst [vmem:[%s1539_s9 + $0x8] sm:$0xff] %v858_v50  ;;  %900 = vmatmul.f32.gmra.mxu2 %v858_v50 }
 0x351   :  { %v905_v51 = vpop.xlane.xlu0 %904 }
 0x352   :  { %v908_v45 = vsub.f32 %v899_v6, %v905_v51 }
 0x354   :  { %v910_v24 = vmul.f32 1.442695, %v908_v45 }
 0x356   :  { %995 = vpow2.f32 %v910_v24 }
 0x35c   :  { %v996_v37 = vpop.eup %995 }
 0x35d   :  { %914 = vadd.xlane.f32.xlu1 %v996_v37 }
 0x38b   :  { %v901_v41 = vpop.f32.mrf.mxu2 }
 0x38c   :  { %v902_v14 = vadd.f32 %v1510_v36, %v901_v41 }
 0x38e   :  { %906 = vmax.xlane.f32.xlu0 %v902_v14 }
 0x3d0   :  { %v915_v53 = vpop.xlane.xlu1 %914 }
 0x3d1   :  { %997 = vlog2.f32 %v915_v53 }
 0x3d7   :  { %v998_v58 = vpop.eup %997 }
 0x3d8   :  { %v919_v62 = vmul.f32 0.6931472, %v998_v58 }
 0x3da   :  { %v922_v7 = vsub.f32 %v908_v45, %v919_v62 }
 0x3dc   :  { %924 = vst [vmem:[%s1538_s8] sm:$0xff] %v922_v7 }
 0x401   :  { %v907_v12 = vpop.xlane.xlu0 %906 }
 0x402   :  { %v909_v43 = vsub.f32 %v902_v14, %v907_v12 }
 0x404   :  { %v912_v18 = vmul.f32 1.442695, %v909_v43 }
 0x406   :  { %999 = vpow2.f32 %v912_v18 }
 0x40c   :  { %v1000_v29 = vpop.eup %999 }
 0x40d   :  { %916 = vadd.xlane.f32.xlu1 %v1000_v29 }
 0x480   :  { %v917_v30 = vpop.xlane.xlu1 %916 }
 0x481   :  { %1001 = vlog2.f32 %v917_v30 }
 0x487   :  { %v1002_v34 = vpop.eup %1001 }
 0x488   :  { %v921_v42 = vmul.f32 0.6931472, %v1002_v34 }
 0x48a   :  { %v923_v48 = vsub.f32 %v909_v43, %v921_v42 }
 0x48c   :  { %925 = vst [vmem:[%s1538_s8 + $0x8] sm:$0xff] %v923_v48 }
 0x48d   :  { %934 = vsyncpa [#allocation3], 1 }
 0x48e   :  { %935 = vsyncpa [#allocation5], 1 }

</bundles_post_ra>
